<compile_context>
chip_gen: v7x
topology: tpu7x:2x2x1
jax: 0.10.0
libtpu: 0.0.40
codegen_flags: <defaults>
</compile_context>

<pallas_src>
import functools

import numpy as np
import jax
import jax.numpy as jnp
from jax.experimental import pallas as pl
from jax.experimental.pallas import tpu as pltpu

VMEM = pltpu.MemorySpace.VMEM
SMEM = pltpu.MemorySpace.SMEM


# ----------------------------------------------------------------------------
# Fused compose + hole + valid + L1(out,gt) + TV kernel  (grid over batch)
# ----------------------------------------------------------------------------
def _fused_loss_kernel(m_ref, x_ref, y_ref, g_ref, comp_ref, sums_ref,
                       *, H, W, inv_n, inv_tvw, inv_tvh):
    b = pl.program_id(0)
    nb = pl.num_programs(0)
    HW = H * W

    m = m_ref[0].astype(jnp.float32)     # (C, H*W)
    x = x_ref[0].astype(jnp.float32)
    y = y_ref[0].astype(jnp.float32)
    g = g_ref[0].astype(jnp.float32)

    comp = m * x + (1.0 - m) * y
    comp_ref[0] = comp.astype(comp_ref.dtype)

    one_m = 1.0 - m
    hole_s = jnp.sum(jnp.abs(one_m * y - one_m * g))
    valid_s = jnp.sum(jnp.abs(m * y - m * g))
    og_s = jnp.sum(jnp.abs(y - g))       # L1(output, gt) numerator (toploss part)

    # Total variation on comp, lane-dense flattened (C, H*W) layout via roll.
    # Masks are built from a rolled iota so they are correct regardless of the
    # rotation direction convention.
    idx = jax.lax.broadcasted_iota(jnp.int32, comp.shape, 1)
    nb_w = pltpu.roll(comp, shift=HW - 1, axis=1)   # W-neighbor
    id_w = pltpu.roll(idx, shift=HW - 1, axis=1)
    nb_h = pltpu.roll(comp, shift=HW - W, axis=1)   # H-neighbor
    id_h = pltpu.roll(idx, shift=HW - W, axis=1)

    w_valid = (jnp.abs(id_w - idx) == 1) & (jnp.minimum(idx, id_w) % W != W - 1)
    h_valid = jnp.abs(id_h - idx) == W
    tv_w = jnp.sum(jnp.where(w_valid, jnp.abs(nb_w - comp), 0.0))
    tv_h = jnp.sum(jnp.where(h_valid, jnp.abs(nb_h - comp), 0.0))

    @pl.when(b == 0)
    def _init():
        for i in range(5):
            sums_ref[0, i] = 0.0

    sums_ref[0, 0] += hole_s
    sums_ref[0, 1] += valid_s
    sums_ref[0, 2] += og_s
    sums_ref[0, 3] += tv_w
    sums_ref[0, 4] += tv_h

    @pl.when(b == nb - 1)
    def _fin():
        sums_ref[0, 0] *= inv_n
        sums_ref[0, 1] *= inv_n
        sums_ref[0, 2] *= inv_n
        sums_ref[0, 3] = sums_ref[0, 3] * inv_tvw + sums_ref[0, 4] * inv_tvh


def fused_compose_and_losses(mask, inp, output, gt):
    B, C, H, W = output.shape
    HW = H * W
    m3 = mask.reshape(B, C, HW)
    x3 = inp.reshape(B, C, HW)
    y3 = output.reshape(B, C, HW)
    g3 = gt.reshape(B, C, HW)

    kernel = functools.partial(
        _fused_loss_kernel, H=H, W=W,
        inv_n=1.0 / (B * C * H * W),
        inv_tvw=1.0 / (B * C * H * (W - 1)),
        inv_tvh=1.0 / (B * C * (H - 1) * W),
    )
    blk = pl.BlockSpec((1, C, HW), lambda b: (b, 0, 0))
    comp3, sums = pl.pallas_call(
        kernel,
        out_shape=(jax.ShapeDtypeStruct((B, C, HW), jnp.float32),
                   jax.ShapeDtypeStruct((1, 5), jnp.float32)),
        grid=(B,),
        in_specs=[blk, blk, blk, blk],
        out_specs=(pl.BlockSpec((1, C, HW), lambda b: (b, 0, 0)),
                   pl.BlockSpec((1, 5), lambda b: (0, 0), memory_space=SMEM)),
        compiler_params=pltpu.CompilerParams(
            dimension_semantics=("arbitrary",)),   # scalar accumulator axis
    )(m3, x3, y3, g3)
    return comp3, sums


# ----------------------------------------------------------------------------
# 1x1 conv + ReLU (+ fused 2x2 avg-pool) — lane-dense W @ X layout
# ----------------------------------------------------------------------------
def _conv_relu_pool_kernel(x_ref, w_ref, b_ref, p_ref, f_ref, pool_ref):
    x = x_ref[0].astype(jnp.float32)                              # (Cin, HW)
    y = jnp.dot(w_ref[...], x, preferred_element_type=jnp.float32)
    y = jnp.maximum(y + b_ref[...], 0.0)                          # (Cout, HW)
    f_ref[0] = y
    # fused 2x2 average pool as a second MXU matmul (HW -> HW/4)
    pool_ref[0] = jnp.dot(y, p_ref[...], preferred_element_type=jnp.float32)


def _conv_relu_kernel(x_ref, w_ref, b_ref, f_ref):
    x = x_ref[0].astype(jnp.float32)
    y = jnp.dot(w_ref[...], x, preferred_element_type=jnp.float32)
    f_ref[0] = jnp.maximum(y + b_ref[...], 0.0)


def conv1x1_relu(x, w, b, pool_mat=None):
    # x: (N, Cin, HW)   w: (Cout, Cin)   b: (Cout, 1)   pool_mat: (HW, HW//4)|None
    N, Cin, HW = x.shape
    Cout = w.shape[0]
    x_spec = pl.BlockSpec((1, Cin, HW), lambda i: (i, 0, 0))
    w_spec = pl.BlockSpec((Cout, Cin), lambda i: (0, 0))
    b_spec = pl.BlockSpec((Cout, 1), lambda i: (0, 0))
    f_spec = pl.BlockSpec((1, Cout, HW), lambda i: (i, 0, 0))
    cp = pltpu.CompilerParams(dimension_semantics=("parallel",))

    if pool_mat is None:
        feat = pl.pallas_call(
            _conv_relu_kernel,
            out_shape=jax.ShapeDtypeStruct((N, Cout, HW), jnp.float32),
            grid=(N,),
            in_specs=[x_spec, w_spec, b_spec],
            out_specs=f_spec,
            compiler_params=cp,
        )(x, w, b)
        return feat, None

    HW4 = pool_mat.shape[1]
    p_spec = pl.BlockSpec((HW, HW4), lambda i: (0, 0))
    pool_spec = pl.BlockSpec((1, Cout, HW4), lambda i: (i, 0, 0))
    feat, pooled = pl.pallas_call(
        _conv_relu_pool_kernel,
        out_shape=(jax.ShapeDtypeStruct((N, Cout, HW), jnp.float32),
                   jax.ShapeDtypeStruct((N, Cout, HW4), jnp.float32)),
        grid=(N,),
        in_specs=[x_spec, w_spec, b_spec, p_spec],
        out_specs=(f_spec, pool_spec),
        compiler_params=cp,
    )(x, w, b, pool_mat)
    return feat, pooled


# ----------------------------------------------------------------------------
# Fused prc + style (gram) loss kernel, one per scale (grid over batch)
# ----------------------------------------------------------------------------
def _prc_style_kernel(fc_ref, fo_ref, fg_ref, acc_ref,
                      *, gram_denom, prc_denom, style_denom):
    b = pl.program_id(0)
    nb = pl.num_programs(0)
    fc = fc_ref[0]            # (C, HW)  output_comp features
    fo = fo_ref[0]            # output features
    fg = fg_ref[0]            # gt features

    prc = jnp.sum(jnp.abs(fo - fg)) + jnp.sum(jnp.abs(fc - fg))

    dims = (((1,), (1,)), ((), ()))
    inv_g = 1.0 / gram_denom
    g_o = jax.lax.dot_general(fo, fo, dims, preferred_element_type=jnp.float32) * inv_g
    g_c = jax.lax.dot_general(fc, fc, dims, preferred_element_type=jnp.float32) * inv_g
    g_g = jax.lax.dot_general(fg, fg, dims, preferred_element_type=jnp.float32) * inv_g
    style = jnp.sum(jnp.abs(g_o - g_g)) + jnp.sum(jnp.abs(g_c - g_g))

    @pl.when(b == 0)
    def _init():
        acc_ref[0, 0] = 0.0
        acc_ref[0, 1] = 0.0

    acc_ref[0, 0] += prc
    acc_ref[0, 1] += style

    @pl.when(b == nb - 1)
    def _fin():
        acc_ref[0, 0] *= 1.0 / prc_denom
        acc_ref[0, 1] *= 1.0 / style_denom


def prc_style_losses(feat_stack, B):
    # feat_stack: (3B, C, HW), laid out as [comp(0:B); out(B:2B); gt(2B:3B)]
    _, C, HW = feat_stack.shape
    kernel = functools.partial(
        _prc_style_kernel,
        gram_denom=float(C * HW),          # gram /= ch*h*w
        prc_denom=float(B * C * HW),       # L1 mean over (B, C, HW)
        style_denom=float(B * C * C),      # L1 mean over (B, C, C)
    )
    spec_c = pl.BlockSpec((1, C, HW), lambda b: (b, 0, 0))
    spec_o = pl.BlockSpec((1, C, HW), lambda b: (b + B, 0, 0))
    spec_g = pl.BlockSpec((1, C, HW), lambda b: (b + 2 * B, 0, 0))
    acc = pl.pallas_call(
        kernel,
        out_shape=jax.ShapeDtypeStruct((1, 2), jnp.float32),
        grid=(B,),
        in_specs=[spec_c, spec_o, spec_g],
        out_specs=pl.BlockSpec((1, 2), lambda b: (0, 0), memory_space=SMEM),
        compiler_params=pltpu.CompilerParams(
            dimension_semantics=("arbitrary",)),
    )(feat_stack, feat_stack, feat_stack)
    return acc[0, 0], acc[0, 1]


# ----------------------------------------------------------------------------
# Small L1 mean (for the tiny z/f tensors of the tloss stand-in)
# ----------------------------------------------------------------------------
def _l1_mean_kernel(a_ref, b_ref, o_ref, *, inv_n):
    o_ref[0, 0] = jnp.sum(jnp.abs(a_ref[...].astype(jnp.float32)
                                  - b_ref[...].astype(jnp.float32))) * inv_n


def l1_mean_small(a, b):
    a2 = a.reshape(-1, a.shape[-1])
    b2 = b.reshape(-1, b.shape[-1])
    kernel = functools.partial(_l1_mean_kernel, inv_n=1.0 / a.size)
    out = pl.pallas_call(
        kernel,
        out_shape=jax.ShapeDtypeStruct((1, 1), jnp.float32),
        in_specs=[pl.BlockSpec(memory_space=VMEM)] * 2,
        out_specs=pl.BlockSpec(memory_space=SMEM),
    )(a2, b2)
    return out[0, 0]


# ----------------------------------------------------------------------------
# Synthetic injected dependencies (deterministic stand-ins)
# ----------------------------------------------------------------------------
def make_extractor_params():
    dims = [(3, 8), (8, 16), (16, 32)]
    keys = jax.random.split(jax.random.PRNGKey(42), 2 * len(dims))
    params = []
    for i, (cin, cout) in enumerate(dims):
        w = 0.2 * jax.random.normal(keys[2 * i], (cout, cin), jnp.float32)
        b = 0.05 * jax.random.normal(keys[2 * i + 1], (cout, 1), jnp.float32)
        params.append((w, b))
    return params


def make_pool_matrix(H, W):
    # sparse (H*W, H*W/4) matrix implementing 2x2 average pooling as a matmul
    H2, W2 = H // 2, W // 2
    P = np.zeros((H * W, H2 * W2), np.float32)
    for h in range(H):
        for w in range(W):
            P[h * W + w, (h // 2) * W2 + (w // 2)] = 0.25
    return jnp.asarray(P)


def extractor(x, params, H, W):
    # x: (N, 3, H*W)  ->  3 feature maps (N, Cout_i, HW_i); pool fused into conv
    feats = []
    cur, h_cur, w_cur = x, H, W
    for stage, (w, b) in enumerate(params):
        pool_mat = make_pool_matrix(h_cur, w_cur) if stage < len(params) - 1 else None
        feat, pooled = conv1x1_relu(cur, w, b, pool_mat)
        feats.append(feat)
        cur, h_cur, w_cur = pooled, h_cur // 2, w_cur // 2
    return feats


# ----------------------------------------------------------------------------
# InpaintingLoss.forward
# ----------------------------------------------------------------------------
def inpainting_loss(inp, mask, output, gt, z, f, extractor_params):
    B, C, H, W = output.shape
    HW = H * W

    comp3, sums = fused_compose_and_losses(mask, inp, output, gt)

    loss = {}
    loss["hole"] = sums[0, 0]
    loss["valid"] = sums[0, 1]
    # .cpu()/.cuda() in the reference are device transfers -> no-ops here.
    # tloss stand-in: L1(output, gt) + L1(z, f); the first term comes from the
    # fused kernel (output/gt were already being read there).
    loss["toploss"] = sums[0, 2] + l1_mean_small(z, f)
    loss["tv"] = sums[0, 3]

    y3 = output.reshape(B, C, HW)
    g3 = gt.reshape(B, C, HW)
    if C == 3:
        stack = jnp.concatenate([comp3, y3, g3], axis=0)          # (3B, 3, HW)
    elif C == 1:
        rep = lambda t: jnp.concatenate([t, t, t], axis=1)
        stack = jnp.concatenate([rep(comp3), rep(y3), rep(g3)], axis=0)
    else:
        raise ValueError("only gray an")

    feats = extractor(stack, extractor_params, H, W)   # one pass over 3B images

    prc = jnp.float32(0.0)
    style = jnp.float32(0.0)
    for feat in feats:
        p_i, s_i = prc_style_losses(feat, B)
        prc = prc + p_i
        style = style + s_i
    loss["prc"] = prc
    loss["style"] = style
    return loss


# ----------------------------------------------------------------------------
if __name__ == "__main__":
    key = jax.random.PRNGKey(0)
    ks = jax.random.split(key, 6)

    B, C, H, W = 2, 3, 16, 16
    inp = jax.random.normal(ks[0], (B, C, H, W), jnp.float32)
    mask = (jax.random.uniform(ks[1], (B, C, H, W)) > 0.5).astype(jnp.float32)
    output = jax.random.normal(ks[2], (B, C, H, W), jnp.float32)
    gt = jax.random.normal(ks[3], (B, C, H, W), jnp.float32)
    z = jax.random.normal(ks[4], (B, 32), jnp.float32)
    f = jax.random.normal(ks[5], (B, 32), jnp.float32)

    params = make_extractor_params()
    loss_fn = jax.jit(inpainting_loss)
    losses = loss_fn(inp, mask, output, gt, z, f, params)
    losses = jax.tree_util.tree_map(jax.block_until_ready, losses)
    print("KERNEL_OK")
</pallas_src>

<mosaic_0001>
module attributes {stable_mosaic.version = 11 : i64} {
  func.func @_l1_mean_kernel(%arg0: memref<2x32xf32, #tpu.memory_space<vmem>>, %arg1: memref<2x32xf32, #tpu.memory_space<vmem>>, %arg2: memref<1x1xf32, #tpu.memory_space<smem>>) attributes {dimension_semantics = [], scalar_prefetch = 0 : i64, scratch_operands = 0 : i64, tpu.core_type = #tpu.core_type<tc>} {
    %c0 = arith.constant 0 : index
    %c0_0 = arith.constant 0 : index
    %0 = vector.load %arg0[%c0, %c0_0] : memref<2x32xf32, #tpu.memory_space<vmem>>, vector<2x32xf32>
    %c0_1 = arith.constant 0 : index
    %c0_2 = arith.constant 0 : index
    %1 = vector.load %arg1[%c0_1, %c0_2] : memref<2x32xf32, #tpu.memory_space<vmem>>, vector<2x32xf32>
    %2 = arith.subf %0, %1 : vector<2x32xf32>
    %3 = math.absf %2 : vector<2x32xf32>
    %4 = vector.shape_cast %3 : vector<2x32xf32> to vector<1x2x32xf32>
    %cst = arith.constant dense<0.000000e+00> : vector<1xf32>
    %5 = vector.multi_reduction <add>, %4, %cst [1, 2] : vector<1x2x32xf32> to vector<1xf32>
    %6 = vector.shape_cast %5 : vector<1xf32> to vector<1x1x1xf32>
    %7 = vector.extract %6[0, 0, 0] : f32 from vector<1x1x1xf32>
    %cst_3 = arith.constant 1.562500e-02 : f32
    %8 = arith.mulf %7, %cst_3 : f32
    %c0_4 = arith.constant 0 : index
    %c0_5 = arith.constant 0 : index
    %9 = memref.load %arg2[%c0_4, %c0_5] : memref<1x1xf32, #tpu.memory_space<smem>>
    memref.store %8, %arg2[%c0_4, %c0_5] : memref<1x1xf32, #tpu.memory_space<smem>>
    return
  }
}

module attributes {stable_mosaic.version = 11 : i64} {
  func.func @_fused_loss_kernel(%arg0: i32, %arg1: memref<1x3x256xf32, #tpu.memory_space<vmem>>, %arg2: memref<1x3x256xf32, #tpu.memory_space<vmem>>, %arg3: memref<1x3x256xf32, #tpu.memory_space<vmem>>, %arg4: memref<1x3x256xf32, #tpu.memory_space<vmem>>, %arg5: memref<1x3x256xf32, #tpu.memory_space<vmem>>, %arg6: memref<1x5xf32, #tpu.memory_space<smem>>) attributes {dimension_semantics = [#tpu.dimension_semantics<arbitrary>], iteration_bounds = array<i64: 2>, scalar_prefetch = 0 : i64, scratch_operands = 0 : i64, tpu.core_type = #tpu.core_type<tc>, window_params = [{transform_indices = @transform_0, window_bounds = array<i64: 1, 3, 256>}, {transform_indices = @transform_1, window_bounds = array<i64: 1, 3, 256>}, {transform_indices = @transform_2, window_bounds = array<i64: 1, 3, 256>}, {transform_indices = @transform_3, window_bounds = array<i64: 1, 3, 256>}, {transform_indices = @transform_4, window_bounds = array<i64: 1, 3, 256>}, {transform_indices = @transform_5, window_bounds = array<i64: 1, 5>}]} {
    %c0 = arith.constant 0 : index
    %c0_0 = arith.constant 0 : index
    %c0_1 = arith.constant 0 : index
    %0 = vector.load %arg1[%c0, %c0_0, %c0_1] : memref<1x3x256xf32, #tpu.memory_space<vmem>>, vector<1x3x256xf32>
    %1 = vector.shape_cast %0 : vector<1x3x256xf32> to vector<3x256xf32>
    %c0_2 = arith.constant 0 : index
    %c0_3 = arith.constant 0 : index
    %c0_4 = arith.constant 0 : index
    %2 = vector.load %arg2[%c0_2, %c0_3, %c0_4] : memref<1x3x256xf32, #tpu.memory_space<vmem>>, vector<1x3x256xf32>
    %3 = vector.shape_cast %2 : vector<1x3x256xf32> to vector<3x256xf32>
    %c0_5 = arith.constant 0 : index
    %c0_6 = arith.constant 0 : index
    %c0_7 = arith.constant 0 : index
    %4 = vector.load %arg3[%c0_5, %c0_6, %c0_7] : memref<1x3x256xf32, #tpu.memory_space<vmem>>, vector<1x3x256xf32>
    %5 = vector.shape_cast %4 : vector<1x3x256xf32> to vector<3x256xf32>
    %c0_8 = arith.constant 0 : index
    %c0_9 = arith.constant 0 : index
    %c0_10 = arith.constant 0 : index
    %6 = vector.load %arg4[%c0_8, %c0_9, %c0_10] : memref<1x3x256xf32, #tpu.memory_space<vmem>>, vector<1x3x256xf32>
    %7 = vector.shape_cast %6 : vector<1x3x256xf32> to vector<3x256xf32>
    %8 = arith.mulf %1, %3 : vector<3x256xf32>
    %cst = arith.constant 1.000000e+00 : f32
    %9 = vector.broadcast %cst : f32 to vector<3x256xf32>
    %10 = arith.subf %9, %1 : vector<3x256xf32>
    %11 = arith.mulf %10, %5 : vector<3x256xf32>
    %12 = arith.addf %8, %11 : vector<3x256xf32>
    %c0_11 = arith.constant 0 : index
    %c0_12 = arith.constant 0 : index
    %c0_13 = arith.constant 0 : index
    %13 = vector.load %arg5[%c0_11, %c0_12, %c0_13] : memref<1x3x256xf32, #tpu.memory_space<vmem>>, vector<1x3x256xf32>
    %14 = vector.shape_cast %13 : vector<1x3x256xf32> to vector<3x256xf32>
    %15 = vector.shape_cast %12 : vector<3x256xf32> to vector<1x3x256xf32>
    tpu.vector_store %arg5[%c0_11, %c0_12, %c0_13], %15 {strides = array<i32>} : memref<1x3x256xf32, #tpu.memory_space<vmem>>, vector<1x3x256xf32>,
    %cst_14 = arith.constant 1.000000e+00 : f32
    %16 = vector.broadcast %cst_14 : f32 to vector<3x256xf32>
    %17 = arith.subf %16, %1 : vector<3x256xf32>
    %18 = arith.mulf %17, %5 : vector<3x256xf32>
    %19 = arith.mulf %17, %7 : vector<3x256xf32>
    %20 = arith.subf %18, %19 : vector<3x256xf32>
    %21 = math.absf %20 : vector<3x256xf32>
    %22 = vector.shape_cast %21 : vector<3x256xf32> to vector<1x3x256xf32>
    %cst_15 = arith.constant dense<0.000000e+00> : vector<1xf32>
    %23 = vector.multi_reduction <add>, %22, %cst_15 [1, 2] : vector<1x3x256xf32> to vector<1xf32>
    %24 = vector.shape_cast %23 : vector<1xf32> to vector<1x1x1xf32>
    %25 = vector.extract %24[0, 0, 0] : f32 from vector<1x1x1xf32>
    %26 = arith.mulf %1, %5 : vector<3x256xf32>
    %27 = arith.mulf %1, %7 : vector<3x256xf32>
    %28 = arith.subf %26, %27 : vector<3x256xf32>
    %29 = math.absf %28 : vector<3x256xf32>
    %30 = vector.shape_cast %29 : vector<3x256xf32> to vector<1x3x256xf32>
    %cst_16 = arith.constant dense<0.000000e+00> : vector<1xf32>
    %31 = vector.multi_reduction <add>, %30, %cst_16 [1, 2] : vector<1x3x256xf32> to vector<1xf32>
    %32 = vector.shape_cast %31 : vector<1xf32> to vector<1x1x1xf32>
    %33 = vector.extract %32[0, 0, 0] : f32 from vector<1x1x1xf32>
    %34 = arith.subf %5, %7 : vector<3x256xf32>
    %35 = math.absf %34 : vector<3x256xf32>
    %36 = vector.shape_cast %35 : vector<3x256xf32> to vector<1x3x256xf32>
    %cst_17 = arith.constant dense<0.000000e+00> : vector<1xf32>
    %37 = vector.multi_reduction <add>, %36, %cst_17 [1, 2] : vector<1x3x256xf32> to vector<1xf32>
    %38 = vector.shape_cast %37 : vector<1xf32> to vector<1x1x1xf32>
    %39 = vector.extract %38[0, 0, 0] : f32 from vector<1x1x1xf32>
    %40 = tpu.iota {dimensions = array<i32: 1>} : vector<3x256xi32>
    %c255_i32 = arith.constant 255 : i32
    %41 = tpu.dynamic_rotate %12 by %c255_i32 dim 1 : vector<3x256xf32>, i32 -> vector<3x256xf32>
    %c255_i32_18 = arith.constant 255 : i32
    %42 = tpu.dynamic_rotate %40 by %c255_i32_18 dim 1 : vector<3x256xi32>, i32 -> vector<3x256xi32>
    %c240_i32 = arith.constant 240 : i32
    %43 = tpu.dynamic_rotate %12 by %c240_i32 dim 1 : vector<3x256xf32>, i32 -> vector<3x256xf32>
    %c240_i32_19 = arith.constant 240 : i32
    %44 = tpu.dynamic_rotate %40 by %c240_i32_19 dim 1 : vector<3x256xi32>, i32 -> vector<3x256xi32>
    %45 = arith.subi %42, %40 : vector<3x256xi32>
    %46 = math.absi %45 : vector<3x256xi32>
    %c1_i32 = arith.constant 1 : i32
    %47 = vector.broadcast %c1_i32 : i32 to vector<3x256xi32>
    %48 = arith.cmpi eq, %46, %47 : vector<3x256xi32>
    %49 = arith.minsi %40, %42 : vector<3x256xi32>
    %c16_i32 = arith.constant 16 : i32
    %c0_i32 = arith.constant 0 : i32
    %50 = arith.cmpi eq, %c16_i32, %c0_i32 : i32
    %c1_i32_20 = arith.constant 1 : i32
    %51 = arith.select %50, %c1_i32_20, %c16_i32 : i32
    %52 = vector.broadcast %51 : i32 to vector<3x256xi32>
    %53 = arith.remsi %49, %52 : vector<3x256xi32>
    %c0_i32_21 = arith.constant 0 : i32
    %54 = vector.broadcast %c0_i32_21 : i32 to vector<3x256xi32>
    %55 = arith.cmpi ne, %53, %54 : vector<3x256xi32>
    %c0_i32_22 = arith.constant 0 : i32
    %56 = vector.broadcast %c0_i32_22 : i32 to vector<3x256xi32>
    %57 = arith.cmpi slt, %53, %56 : vector<3x256xi32>
    %c0_i32_23 = arith.constant 0 : i32
    %58 = arith.cmpi slt, %51, %c0_i32_23 : i32
    %59 = vector.broadcast %58 : i1 to vector<3x256xi1>
    %60 = vector.broadcast %59 : vector<3x256xi1> to vector<3x256xi1>
    %61 = arith.xori %57, %60 : vector<3x256xi1>
    %62 = arith.andi %61, %55 : vector<3x256xi1>
    %63 = vector.broadcast %51 : i32 to vector<3x256xi32>
    %64 = arith.addi %53, %63 : vector<3x256xi32>
    %65 = arith.select %62, %64, %53 : vector<3x256xi1>, vector<3x256xi32>
    %c15_i32 = arith.constant 15 : i32
    %66 = vector.broadcast %c15_i32 : i32 to vector<3x256xi32>
    %67 = arith.cmpi ne, %65, %66 : vector<3x256xi32>
    %68 = arith.andi %48, %67 : vector<3x256xi1>
    %69 = arith.subi %44, %40 : vector<3x256xi32>
    %70 = math.absi %69 : vector<3x256xi32>
    %c16_i32_24 = arith.constant 16 : i32
    %71 = vector.broadcast %c16_i32_24 : i32 to vector<3x256xi32>
    %72 = arith.cmpi eq, %70, %71 : vector<3x256xi32>
    %73 = arith.subf %41, %12 : vector<3x256xf32>
    %74 = math.absf %73 : vector<3x256xf32>
    %cst_25 = arith.constant 0.000000e+00 : f32
    %75 = vector.broadcast %cst_25 : f32 to vector<3x256xf32>
    %76 = arith.select %68, %74, %75 : vector<3x256xi1>, vector<3x256xf32>
    %77 = vector.shape_cast %76 : vector<3x256xf32> to vector<1x3x256xf32>
    %cst_26 = arith.constant dense<0.000000e+00> : vector<1xf32>
    %78 = vector.multi_reduction <add>, %77, %cst_26 [1, 2] : vector<1x3x256xf32> to vector<1xf32>
    %79 = vector.shape_cast %78 : vector<1xf32> to vector<1x1x1xf32>
    %80 = vector.extract %79[0, 0, 0] : f32 from vector<1x1x1xf32>
    %81 = arith.subf %43, %12 : vector<3x256xf32>
    %82 = math.absf %81 : vector<3x256xf32>
    %cst_27 = arith.constant 0.000000e+00 : f32
    %83 = vector.broadcast %cst_27 : f32 to vector<3x256xf32>
    %84 = arith.select %72, %82, %83 : vector<3x256xi1>, vector<3x256xf32>
    %85 = vector.shape_cast %84 : vector<3x256xf32> to vector<1x3x256xf32>
    %cst_28 = arith.constant dense<0.000000e+00> : vector<1xf32>
    %86 = vector.multi_reduction <add>, %85, %cst_28 [1, 2] : vector<1x3x256xf32> to vector<1xf32>
    %87 = vector.shape_cast %86 : vector<1xf32> to vector<1x1x1xf32>
    %88 = vector.extract %87[0, 0, 0] : f32 from vector<1x1x1xf32>
    %c0_i32_29 = arith.constant 0 : i32
    %89 = arith.cmpi eq, %arg0, %c0_i32_29 : i32
    %90 = arith.extui %89 : i1 to i32
    %c0_i32_30 = arith.constant 0 : i32
    %91 = arith.cmpi ne, %90, %c0_i32_30 : i32
    scf.if %91 {
      %cst_49 = arith.constant 0.000000e+00 : f32
      %c0_50 = arith.constant 0 : index
      %c0_51 = arith.constant 0 : index
      %110 = memref.load %arg6[%c0_50, %c0_51] : memref<1x5xf32, #tpu.memory_space<smem>>
      memref.store %cst_49, %arg6[%c0_50, %c0_51] : memref<1x5xf32, #tpu.memory_space<smem>>
      %cst_52 = arith.constant 0.000000e+00 : f32
      %c0_53 = arith.constant 0 : index
      %c1_54 = arith.constant 1 : index
      %111 = memref.load %arg6[%c0_53, %c1_54] : memref<1x5xf32, #tpu.memory_space<smem>>
      memref.store %cst_52, %arg6[%c0_53, %c1_54] : memref<1x5xf32, #tpu.memory_space<smem>>
      %cst_55 = arith.constant 0.000000e+00 : f32
      %c0_56 = arith.constant 0 : index
      %c2_57 = arith.constant 2 : index
      %112 = memref.load %arg6[%c0_56, %c2_57] : memref<1x5xf32, #tpu.memory_space<smem>>
      memref.store %cst_55, %arg6[%c0_56, %c2_57] : memref<1x5xf32, #tpu.memory_space<smem>>
      %cst_58 = arith.constant 0.000000e+00 : f32
      %c0_59 = arith.constant 0 : index
      %c3_60 = arith.constant 3 : index
      %113 = memref.load %arg6[%c0_59, %c3_60] : memref<1x5xf32, #tpu.memory_space<smem>>
      memref.store %cst_58, %arg6[%c0_59, %c3_60] : memref<1x5xf32, #tpu.memory_space<smem>>
      %cst_61 = arith.constant 0.000000e+00 : f32
      %c0_62 = arith.constant 0 : index
      %c4_63 = arith.constant 4 : index
      %114 = memref.load %arg6[%c0_62, %c4_63] : memref<1x5xf32, #tpu.memory_space<smem>>
      memref.store %cst_61, %arg6[%c0_62, %c4_63] : memref<1x5xf32, #tpu.memory_space<smem>>
    } else {
    }
    %c0_31 = arith.constant 0 : index
    %c0_32 = arith.constant 0 : index
    %92 = memref.load %arg6[%c0_31, %c0_32] : memref<1x5xf32, #tpu.memory_space<smem>>
    %93 = arith.addf %92, %25 : f32
    %c0_33 = arith.constant 0 : index
    %c0_34 = arith.constant 0 : index
    %94 = memref.load %arg6[%c0_33, %c0_34] : memref<1x5xf32, #tpu.memory_space<smem>>
    memref.store %93, %arg6[%c0_33, %c0_34] : memref<1x5xf32, #tpu.memory_space<smem>>
    %c0_35 = arith.constant 0 : index
    %c1 = arith.constant 1 : index
    %95 = memref.load %arg6[%c0_35, %c1] : memref<1x5xf32, #tpu.memory_space<smem>>
    %96 = arith.addf %95, %33 : f32
    %c0_36 = arith.constant 0 : index
    %c1_37 = arith.constant 1 : index
    %97 = memref.load %arg6[%c0_36, %c1_37] : memref<1x5xf32, #tpu.memory_space<smem>>
    memref.store %96, %arg6[%c0_36, %c1_37] : memref<1x5xf32, #tpu.memory_space<smem>>
    %c0_38 = arith.constant 0 : index
    %c2 = arith.constant 2 : index
    %98 = memref.load %arg6[%c0_38, %c2] : memref<1x5xf32, #tpu.memory_space<smem>>
    %99 = arith.addf %98, %39 : f32
    %c0_39 = arith.constant 0 : index
    %c2_40 = arith.constant 2 : index
    %100 = memref.load %arg6[%c0_39, %c2_40] : memref<1x5xf32, #tpu.memory_space<smem>>
    memref.store %99, %arg6[%c0_39, %c2_40] : memref<1x5xf32, #tpu.memory_space<smem>>
    %c0_41 = arith.constant 0 : index
    %c3 = arith.constant 3 : index
    %101 = memref.load %arg6[%c0_41, %c3] : memref<1x5xf32, #tpu.memory_space<smem>>
    %102 = arith.addf %101, %80 : f32
    %c0_42 = arith.constant 0 : index
    %c3_43 = arith.constant 3 : index
    %103 = memref.load %arg6[%c0_42, %c3_43] : memref<1x5xf32, #tpu.memory_space<smem>>
    memref.store %102, %arg6[%c0_42, %c3_43] : memref<1x5xf32, #tpu.memory_space<smem>>
    %c0_44 = arith.constant 0 : index
    %c4 = arith.constant 4 : index
    %104 = memref.load %arg6[%c0_44, %c4] : memref<1x5xf32, #tpu.memory_space<smem>>
    %105 = arith.addf %104, %88 : f32
    %c0_45 = arith.constant 0 : index
    %c4_46 = arith.constant 4 : index
    %106 = memref.load %arg6[%c0_45, %c4_46] : memref<1x5xf32, #tpu.memory_space<smem>>
    memref.store %105, %arg6[%c0_45, %c4_46] : memref<1x5xf32, #tpu.memory_space<smem>>
    %c1_i32_47 = arith.constant 1 : i32
    %107 = arith.cmpi eq, %arg0, %c1_i32_47 : i32
    %108 = arith.extui %107 : i1 to i32
    %c0_i32_48 = arith.constant 0 : i32
    %109 = arith.cmpi ne, %108, %c0_i32_48 : i32
    scf.if %109 {
      %c0_49 = arith.constant 0 : index
      %c0_50 = arith.constant 0 : index
      %110 = memref.load %arg6[%c0_49, %c0_50] : memref<1x5xf32, #tpu.memory_space<smem>>
      %cst_51 = arith.constant 6.51041686E-4 : f32
      %111 = arith.mulf %110, %cst_51 : f32
      %c0_52 = arith.constant 0 : index
      %c0_53 = arith.constant 0 : index
      %112 = memref.load %arg6[%c0_52, %c0_53] : memref<1x5xf32, #tpu.memory_space<smem>>
      memref.store %111, %arg6[%c0_52, %c0_53] : memref<1x5xf32, #tpu.memory_space<smem>>
      %c0_54 = arith.constant 0 : index
      %c1_55 = arith.constant 1 : index
      %113 = memref.load %arg6[%c0_54, %c1_55] : memref<1x5xf32, #tpu.memory_space<smem>>
      %cst_56 = arith.constant 6.51041686E-4 : f32
      %114 = arith.mulf %113, %cst_56 : f32
      %c0_57 = arith.constant 0 : index
      %c1_58 = arith.constant 1 : index
      %115 = memref.load %arg6[%c0_57, %c1_58] : memref<1x5xf32, #tpu.memory_space<smem>>
      memref.store %114, %arg6[%c0_57, %c1_58] : memref<1x5xf32, #tpu.memory_space<smem>>
      %c0_59 = arith.constant 0 : index
      %c2_60 = arith.constant 2 : index
      %116 = memref.load %arg6[%c0_59, %c2_60] : memref<1x5xf32, #tpu.memory_space<smem>>
      %cst_61 = arith.constant 6.51041686E-4 : f32
      %117 = arith.mulf %116, %cst_61 : f32
      %c0_62 = arith.constant 0 : index
      %c2_63 = arith.constant 2 : index
      %118 = memref.load %arg6[%c0_62, %c2_63] : memref<1x5xf32, #tpu.memory_space<smem>>
      memref.store %117, %arg6[%c0_62, %c2_63] : memref<1x5xf32, #tpu.memory_space<smem>>
      %c0_64 = arith.constant 0 : index
      %c3_65 = arith.constant 3 : index
      %119 = memref.load %arg6[%c0_64, %c3_65] : memref<1x5xf32, #tpu.memory_space<smem>>
      %cst_66 = arith.constant 6.94444461E-4 : f32
      %120 = arith.mulf %119, %cst_66 : f32
      %c0_67 = arith.constant 0 : index
      %c4_68 = arith.constant 4 : index
      %121 = memref.load %arg6[%c0_67, %c4_68] : memref<1x5xf32, #tpu.memory_space<smem>>
      %cst_69 = arith.constant 6.94444461E-4 : f32
      %122 = arith.mulf %121, %cst_69 : f32
      %123 = arith.addf %120, %122 : f32
      %c0_70 = arith.constant 0 : index
      %c3_71 = arith.constant 3 : index
      %124 = memref.load %arg6[%c0_70, %c3_71] : memref<1x5xf32, #tpu.memory_space<smem>>
      memref.store %123, %arg6[%c0_70, %c3_71] : memref<1x5xf32, #tpu.memory_space<smem>>
    } else {
    }
    return
  }
  func.func @transform_0(%arg0: i32) -> (i32, i32, i32) {
    %c0_i32 = arith.constant 0 : i32
    %c0_i32_0 = arith.constant 0 : i32
    %c0_i32_1 = arith.constant 0 : i32
    return %arg0, %c0_i32, %c0_i32_0 : i32, i32, i32
  }
  func.func @transform_1(%arg0: i32) -> (i32, i32, i32) {
    %c0_i32 = arith.constant 0 : i32
    %c0_i32_0 = arith.constant 0 : i32
    %c0_i32_1 = arith.constant 0 : i32
    return %arg0, %c0_i32, %c0_i32_0 : i32, i32, i32
  }
  func.func @transform_2(%arg0: i32) -> (i32, i32, i32) {
    %c0_i32 = arith.constant 0 : i32
    %c0_i32_0 = arith.constant 0 : i32
    %c0_i32_1 = arith.constant 0 : i32
    return %arg0, %c0_i32, %c0_i32_0 : i32, i32, i32
  }
  func.func @transform_3(%arg0: i32) -> (i32, i32, i32) {
    %c0_i32 = arith.constant 0 : i32
    %c0_i32_0 = arith.constant 0 : i32
    %c0_i32_1 = arith.constant 0 : i32
    return %arg0, %c0_i32, %c0_i32_0 : i32, i32, i32
  }
  func.func @transform_4(%arg0: i32) -> (i32, i32, i32) {
    %c0_i32 = arith.constant 0 : i32
    %c0_i32_0 = arith.constant 0 : i32
    %c0_i32_1 = arith.constant 0 : i32
    return %arg0, %c0_i32, %c0_i32_0 : i32, i32, i32
  }
  func.func @transform_5(%arg0: i32) -> (i32, i32) {
    %c0_i32 = arith.constant 0 : i32
    %c0_i32_0 = arith.constant 0 : i32
    %c0_i32_1 = arith.constant 0 : i32
    return %c0_i32, %c0_i32_0 : i32, i32
  }
}

module attributes {stable_mosaic.version = 11 : i64} {
  func.func @_conv_relu_pool_kernel(%arg0: i32, %arg1: memref<1x3x256xf32, #tpu.memory_space<vmem>>, %arg2: memref<8x3xf32, #tpu.memory_space<vmem>>, %arg3: memref<8x1xf32, #tpu.memory_space<vmem>>, %arg4: memref<256x64xf32, #tpu.memory_space<vmem>>, %arg5: memref<1x8x256xf32, #tpu.memory_space<vmem>>, %arg6: memref<1x8x64xf32, #tpu.memory_space<vmem>>) attributes {dimension_semantics = [#tpu.dimension_semantics<parallel>], iteration_bounds = array<i64: 6>, scalar_prefetch = 0 : i64, scratch_operands = 0 : i64, tpu.core_type = #tpu.core_type<tc>, window_params = [{transform_indices = @transform_0, window_bounds = array<i64: 1, 3, 256>}, {pipeline_mode = #tpu.pipeline_mode<synchronous>, transform_indices = @transform_1, window_bounds = array<i64: 8, 3>}, {pipeline_mode = #tpu.pipeline_mode<synchronous>, transform_indices = @transform_2, window_bounds = array<i64: 8, 1>}, {pipeline_mode = #tpu.pipeline_mode<synchronous>, transform_indices = @transform_3, window_bounds = array<i64: 256, 64>}, {transform_indices = @transform_4, window_bounds = array<i64: 1, 8, 256>}, {transform_indices = @transform_5, window_bounds = array<i64: 1, 8, 64>}]} {
    %c0 = arith.constant 0 : index
    %c0_0 = arith.constant 0 : index
    %c0_1 = arith.constant 0 : index
    %0 = vector.load %arg1[%c0, %c0_0, %c0_1] : memref<1x3x256xf32, #tpu.memory_space<vmem>>, vector<1x3x256xf32>
    %1 = vector.shape_cast %0 : vector<1x3x256xf32> to vector<3x256xf32>
    %c0_2 = arith.constant 0 : index
    %c0_3 = arith.constant 0 : index
    %2 = vector.load %arg2[%c0_2, %c0_3] : memref<8x3xf32, #tpu.memory_space<vmem>>, vector<8x3xf32>
    %cst = arith.constant dense<0.000000e+00> : vector<8x256xf32>
    %3 = tpu.matmul %2, %1, %cst {dimension_numbers = #tpu.dot_dimension_numbers<[1], [0], [0], [1], [0, 0, 1, 1], [], []>} : vector<8x3xf32>, vector<3x256xf32>, vector<8x256xf32> -> vector<8x256xf32>
    %c0_4 = arith.constant 0 : index
    %c0_5 = arith.constant 0 : index
    %4 = vector.load %arg3[%c0_4, %c0_5] : memref<8x1xf32, #tpu.memory_space<vmem>>, vector<8x1xf32>
    %5 = vector.broadcast %4 : vector<8x1xf32> to vector<8x256xf32>
    %6 = arith.addf %3, %5 : vector<8x256xf32>
    %cst_6 = arith.constant 0.000000e+00 : f32
    %7 = vector.broadcast %cst_6 : f32 to vector<8x256xf32>
    %8 = arith.maximumf %6, %7 : vector<8x256xf32>
    %c0_7 = arith.constant 0 : index
    %c0_8 = arith.constant 0 : index
    %c0_9 = arith.constant 0 : index
    %9 = vector.load %arg5[%c0_7, %c0_8, %c0_9] : memref<1x8x256xf32, #tpu.memory_space<vmem>>, vector<1x8x256xf32>
    %10 = vector.shape_cast %9 : vector<1x8x256xf32> to vector<8x256xf32>
    %11 = vector.shape_cast %8 : vector<8x256xf32> to vector<1x8x256xf32>
    tpu.vector_store %arg5[%c0_7, %c0_8, %c0_9], %11 {strides = array<i32>} : memref<1x8x256xf32, #tpu.memory_space<vmem>>, vector<1x8x256xf32>,
    %c0_10 = arith.constant 0 : index
    %c0_11 = arith.constant 0 : index
    %12 = vector.load %arg4[%c0_10, %c0_11] : memref<256x64xf32, #tpu.memory_space<vmem>>, vector<256x64xf32>
    %cst_12 = arith.constant dense<0.000000e+00> : vector<8x64xf32>
    %13 = tpu.matmul %8, %12, %cst_12 {dimension_numbers = #tpu.dot_dimension_numbers<[1], [0], [0], [1], [0, 0, 1, 1], [], []>} : vector<8x256xf32>, vector<256x64xf32>, vector<8x64xf32> -> vector<8x64xf32>
    %c0_13 = arith.constant 0 : index
    %c0_14 = arith.constant 0 : index
    %c0_15 = arith.constant 0 : index
    %14 = vector.load %arg6[%c0_13, %c0_14, %c0_15] : memref<1x8x64xf32, #tpu.memory_space<vmem>>, vector<1x8x64xf32>
    %15 = vector.shape_cast %14 : vector<1x8x64xf32> to vector<8x64xf32>
    %16 = vector.shape_cast %13 : vector<8x64xf32> to vector<1x8x64xf32>
    tpu.vector_store %arg6[%c0_13, %c0_14, %c0_15], %16 {strides = array<i32>} : memref<1x8x64xf32, #tpu.memory_space<vmem>>, vector<1x8x64xf32>,
    return
  }
  func.func @transform_0(%arg0: i32) -> (i32, i32, i32) {
    %c0_i32 = arith.constant 0 : i32
    %c0_i32_0 = arith.constant 0 : i32
    %c0_i32_1 = arith.constant 0 : i32
    return %arg0, %c0_i32, %c0_i32_0 : i32, i32, i32
  }
  func.func @transform_1(%arg0: i32) -> (i32, i32) {
    %c0_i32 = arith.constant 0 : i32
    %c0_i32_0 = arith.constant 0 : i32
    %c0_i32_1 = arith.constant 0 : i32
    return %c0_i32, %c0_i32_0 : i32, i32
  }
  func.func @transform_2(%arg0: i32) -> (i32, i32) {
    %c0_i32 = arith.constant 0 : i32
    %c0_i32_0 = arith.constant 0 : i32
    %c0_i32_1 = arith.constant 0 : i32
    return %c0_i32, %c0_i32_0 : i32, i32
  }
  func.func @transform_3(%arg0: i32) -> (i32, i32) {
    %c0_i32 = arith.constant 0 : i32
    %c0_i32_0 = arith.constant 0 : i32
    %c0_i32_1 = arith.constant 0 : i32
    return %c0_i32, %c0_i32_0 : i32, i32
  }
  func.func @transform_4(%arg0: i32) -> (i32, i32, i32) {
    %c0_i32 = arith.constant 0 : i32
    %c0_i32_0 = arith.constant 0 : i32
    %c0_i32_1 = arith.constant 0 : i32
    return %arg0, %c0_i32, %c0_i32_0 : i32, i32, i32
  }
  func.func @transform_5(%arg0: i32) -> (i32, i32, i32) {
    %c0_i32 = arith.constant 0 : i32
    %c0_i32_0 = arith.constant 0 : i32
    %c0_i32_1 = arith.constant 0 : i32
    return %arg0, %c0_i32, %c0_i32_0 : i32, i32, i32
  }
}

module attributes {stable_mosaic.version = 11 : i64} {
  func.func @_prc_style_kernel(%arg0: i32, %arg1: memref<1x8x256xf32, #tpu.memory_space<vmem>>, %arg2: memref<1x8x256xf32, #tpu.memory_space<vmem>>, %arg3: memref<1x8x256xf32, #tpu.memory_space<vmem>>, %arg4: memref<1x2xf32, #tpu.memory_space<smem>>) attributes {dimension_semantics = [#tpu.dimension_semantics<arbitrary>], iteration_bounds = array<i64: 2>, scalar_prefetch = 0 : i64, scratch_operands = 0 : i64, tpu.core_type = #tpu.core_type<tc>, window_params = [{transform_indices = @transform_0, window_bounds = array<i64: 1, 8, 256>}, {transform_indices = @transform_1, window_bounds = array<i64: 1, 8, 256>}, {transform_indices = @transform_2, window_bounds = array<i64: 1, 8, 256>}, {transform_indices = @transform_3, window_bounds = array<i64: 1, 2>}]} {
    %c0 = arith.constant 0 : index
    %c0_0 = arith.constant 0 : index
    %c0_1 = arith.constant 0 : index
    %0 = vector.load %arg1[%c0, %c0_0, %c0_1] : memref<1x8x256xf32, #tpu.memory_space<vmem>>, vector<1x8x256xf32>
    %1 = vector.shape_cast %0 : vector<1x8x256xf32> to vector<8x256xf32>
    %c0_2 = arith.constant 0 : index
    %c0_3 = arith.constant 0 : index
    %c0_4 = arith.constant 0 : index
    %2 = vector.load %arg2[%c0_2, %c0_3, %c0_4] : memref<1x8x256xf32, #tpu.memory_space<vmem>>, vector<1x8x256xf32>
    %3 = vector.shape_cast %2 : vector<1x8x256xf32> to vector<8x256xf32>
    %c0_5 = arith.constant 0 : index
    %c0_6 = arith.constant 0 : index
    %c0_7 = arith.constant 0 : index
    %4 = vector.load %arg3[%c0_5, %c0_6, %c0_7] : memref<1x8x256xf32, #tpu.memory_space<vmem>>, vector<1x8x256xf32>
    %5 = vector.shape_cast %4 : vector<1x8x256xf32> to vector<8x256xf32>
    %6 = arith.subf %3, %5 : vector<8x256xf32>
    %7 = math.absf %6 : vector<8x256xf32>
    %8 = vector.shape_cast %7 : vector<8x256xf32> to vector<1x8x256xf32>
    %cst = arith.constant dense<0.000000e+00> : vector<1xf32>
    %9 = vector.multi_reduction <add>, %8, %cst [1, 2] : vector<1x8x256xf32> to vector<1xf32>
    %10 = vector.shape_cast %9 : vector<1xf32> to vector<1x1x1xf32>
    %11 = vector.extract %10[0, 0, 0] : f32 from vector<1x1x1xf32>
    %12 = arith.subf %1, %5 : vector<8x256xf32>
    %13 = math.absf %12 : vector<8x256xf32>
    %14 = vector.shape_cast %13 : vector<8x256xf32> to vector<1x8x256xf32>
    %cst_8 = arith.constant dense<0.000000e+00> : vector<1xf32>
    %15 = vector.multi_reduction <add>, %14, %cst_8 [1, 2] : vector<1x8x256xf32> to vector<1xf32>
    %16 = vector.shape_cast %15 : vector<1xf32> to vector<1x1x1xf32>
    %17 = vector.extract %16[0, 0, 0] : f32 from vector<1x1x1xf32>
    %18 = arith.addf %11, %17 : f32
    %cst_9 = arith.constant dense<0.000000e+00> : vector<8x8xf32>
    %19 = tpu.matmul %3, %3, %cst_9 {dimension_numbers = #tpu.dot_dimension_numbers<[1], [1], [0], [0], [0, 0, 1, 0], [], []>} : vector<8x256xf32>, vector<8x256xf32>, vector<8x8xf32> -> vector<8x8xf32>
    %cst_10 = arith.constant 4.8828125E-4 : f32
    %20 = vector.broadcast %cst_10 : f32 to vector<8x8xf32>
    %21 = arith.mulf %19, %20 : vector<8x8xf32>
    %cst_11 = arith.constant dense<0.000000e+00> : vector<8x8xf32>
    %22 = tpu.matmul %1, %1, %cst_11 {dimension_numbers = #tpu.dot_dimension_numbers<[1], [1], [0], [0], [0, 0, 1, 0], [], []>} : vector<8x256xf32>, vector<8x256xf32>, vector<8x8xf32> -> vector<8x8xf32>
    %cst_12 = arith.constant 4.8828125E-4 : f32
    %23 = vector.broadcast %cst_12 : f32 to vector<8x8xf32>
    %24 = arith.mulf %22, %23 : vector<8x8xf32>
    %cst_13 = arith.constant dense<0.000000e+00> : vector<8x8xf32>
    %25 = tpu.matmul %5, %5, %cst_13 {dimension_numbers = #tpu.dot_dimension_numbers<[1], [1], [0], [0], [0, 0, 1, 0], [], []>} : vector<8x256xf32>, vector<8x256xf32>, vector<8x8xf32> -> vector<8x8xf32>
    %cst_14 = arith.constant 4.8828125E-4 : f32
    %26 = vector.broadcast %cst_14 : f32 to vector<8x8xf32>
    %27 = arith.mulf %25, %26 : vector<8x8xf32>
    %28 = arith.subf %21, %27 : vector<8x8xf32>
    %29 = math.absf %28 : vector<8x8xf32>
    %30 = vector.shape_cast %29 : vector<8x8xf32> to vector<1x8x8xf32>
    %cst_15 = arith.constant dense<0.000000e+00> : vector<1xf32>
    %31 = vector.multi_reduction <add>, %30, %cst_15 [1, 2] : vector<1x8x8xf32> to vector<1xf32>
    %32 = vector.shape_cast %31 : vector<1xf32> to vector<1x1x1xf32>
    %33 = vector.extract %32[0, 0, 0] : f32 from vector<1x1x1xf32>
    %34 = arith.subf %24, %27 : vector<8x8xf32>
    %35 = math.absf %34 : vector<8x8xf32>
    %36 = vector.shape_cast %35 : vector<8x8xf32> to vector<1x8x8xf32>
    %cst_16 = arith.constant dense<0.000000e+00> : vector<1xf32>
    %37 = vector.multi_reduction <add>, %36, %cst_16 [1, 2] : vector<1x8x8xf32> to vector<1xf32>
    %38 = vector.shape_cast %37 : vector<1xf32> to vector<1x1x1xf32>
    %39 = vector.extract %38[0, 0, 0] : f32 from vector<1x1x1xf32>
    %40 = arith.addf %33, %39 : f32
    %c0_i32 = arith.constant 0 : i32
    %41 = arith.cmpi eq, %arg0, %c0_i32 : i32
    %42 = arith.extui %41 : i1 to i32
    %c0_i32_17 = arith.constant 0 : i32
    %43 = arith.cmpi ne, %42, %c0_i32_17 : i32
    scf.if %43 {
      %cst_26 = arith.constant 0.000000e+00 : f32
      %c0_27 = arith.constant 0 : index
      %c0_28 = arith.constant 0 : index
      %53 = memref.load %arg4[%c0_27, %c0_28] : memref<1x2xf32, #tpu.memory_space<smem>>
      memref.store %cst_26, %arg4[%c0_27, %c0_28] : memref<1x2xf32, #tpu.memory_space<smem>>
      %cst_29 = arith.constant 0.000000e+00 : f32
      %c0_30 = arith.constant 0 : index
      %c1_31 = arith.constant 1 : index
      %54 = memref.load %arg4[%c0_30, %c1_31] : memref<1x2xf32, #tpu.memory_space<smem>>
      memref.store %cst_29, %arg4[%c0_30, %c1_31] : memref<1x2xf32, #tpu.memory_space<smem>>
    } else {
    }
    %c0_18 = arith.constant 0 : index
    %c0_19 = arith.constant 0 : index
    %44 = memref.load %arg4[%c0_18, %c0_19] : memref<1x2xf32, #tpu.memory_space<smem>>
    %45 = arith.addf %44, %18 : f32
    %c0_20 = arith.constant 0 : index
    %c0_21 = arith.constant 0 : index
    %46 = memref.load %arg4[%c0_20, %c0_21] : memref<1x2xf32, #tpu.memory_space<smem>>
    memref.store %45, %arg4[%c0_20, %c0_21] : memref<1x2xf32, #tpu.memory_space<smem>>
    %c0_22 = arith.constant 0 : index
    %c1 = arith.constant 1 : index
    %47 = memref.load %arg4[%c0_22, %c1] : memref<1x2xf32, #tpu.memory_space<smem>>
    %48 = arith.addf %47, %40 : f32
    %c0_23 = arith.constant 0 : index
    %c1_24 = arith.constant 1 : index
    %49 = memref.load %arg4[%c0_23, %c1_24] : memref<1x2xf32, #tpu.memory_space<smem>>
    memref.store %48, %arg4[%c0_23, %c1_24] : memref<1x2xf32, #tpu.memory_space<smem>>
    %c1_i32 = arith.constant 1 : i32
    %50 = arith.cmpi eq, %arg0, %c1_i32 : i32
    %51 = arith.extui %50 : i1 to i32
    %c0_i32_25 = arith.constant 0 : i32
    %52 = arith.cmpi ne, %51, %c0_i32_25 : i32
    scf.if %52 {
      %c0_26 = arith.constant 0 : index
      %c0_27 = arith.constant 0 : index
      %53 = memref.load %arg4[%c0_26, %c0_27] : memref<1x2xf32, #tpu.memory_space<smem>>
      %cst_28 = arith.constant 2.44140625E-4 : f32
      %54 = arith.mulf %53, %cst_28 : f32
      %c0_29 = arith.constant 0 : index
      %c0_30 = arith.constant 0 : index
      %55 = memref.load %arg4[%c0_29, %c0_30] : memref<1x2xf32, #tpu.memory_space<smem>>
      memref.store %54, %arg4[%c0_29, %c0_30] : memref<1x2xf32, #tpu.memory_space<smem>>
      %c0_31 = arith.constant 0 : index
      %c1_32 = arith.constant 1 : index
      %56 = memref.load %arg4[%c0_31, %c1_32] : memref<1x2xf32, #tpu.memory_space<smem>>
      %cst_33 = arith.constant 7.812500e-03 : f32
      %57 = arith.mulf %56, %cst_33 : f32
      %c0_34 = arith.constant 0 : index
      %c1_35 = arith.constant 1 : index
      %58 = memref.load %arg4[%c0_34, %c1_35] : memref<1x2xf32, #tpu.memory_space<smem>>
      memref.store %57, %arg4[%c0_34, %c1_35] : memref<1x2xf32, #tpu.memory_space<smem>>
    } else {
    }
    return
  }
  func.func @transform_0(%arg0: i32) -> (i32, i32, i32) {
    %c0_i32 = arith.constant 0 : i32
    %c0_i32_0 = arith.constant 0 : i32
    %c0_i32_1 = arith.constant 0 : i32
    return %arg0, %c0_i32, %c0_i32_0 : i32, i32, i32
  }
  func.func @transform_1(%arg0: i32) -> (i32, i32, i32) {
    %c2_i32 = arith.constant 2 : i32
    %0 = arith.addi %arg0, %c2_i32 : i32
    %c0_i32 = arith.constant 0 : i32
    %c0_i32_0 = arith.constant 0 : i32
    %c0_i32_1 = arith.constant 0 : i32
    return %0, %c0_i32, %c0_i32_0 : i32, i32, i32
  }
  func.func @transform_2(%arg0: i32) -> (i32, i32, i32) {
    %c4_i32 = arith.constant 4 : i32
    %0 = arith.addi %arg0, %c4_i32 : i32
    %c0_i32 = arith.constant 0 : i32
    %c0_i32_0 = arith.constant 0 : i32
    %c0_i32_1 = arith.constant 0 : i32
    return %0, %c0_i32, %c0_i32_0 : i32, i32, i32
  }
  func.func @transform_3(%arg0: i32) -> (i32, i32) {
    %c0_i32 = arith.constant 0 : i32
    %c0_i32_0 = arith.constant 0 : i32
    %c0_i32_1 = arith.constant 0 : i32
    return %c0_i32, %c0_i32_0 : i32, i32
  }
}

module attributes {stable_mosaic.version = 11 : i64} {
  func.func @_conv_relu_pool_kernel(%arg0: i32, %arg1: memref<1x8x64xf32, #tpu.memory_space<vmem>>, %arg2: memref<16x8xf32, #tpu.memory_space<vmem>>, %arg3: memref<16x1xf32, #tpu.memory_space<vmem>>, %arg4: memref<64x16xf32, #tpu.memory_space<vmem>>, %arg5: memref<1x16x64xf32, #tpu.memory_space<vmem>>, %arg6: memref<1x16x16xf32, #tpu.memory_space<vmem>>) attributes {dimension_semantics = [#tpu.dimension_semantics<parallel>], iteration_bounds = array<i64: 6>, scalar_prefetch = 0 : i64, scratch_operands = 0 : i64, tpu.core_type = #tpu.core_type<tc>, window_params = [{transform_indices = @transform_0, window_bounds = array<i64: 1, 8, 64>}, {pipeline_mode = #tpu.pipeline_mode<synchronous>, transform_indices = @transform_1, window_bounds = array<i64: 16, 8>}, {pipeline_mode = #tpu.pipeline_mode<synchronous>, transform_indices = @transform_2, window_bounds = array<i64: 16, 1>}, {pipeline_mode = #tpu.pipeline_mode<synchronous>, transform_indices = @transform_3, window_bounds = array<i64: 64, 16>}, {transform_indices = @transform_4, window_bounds = array<i64: 1, 16, 64>}, {transform_indices = @transform_5, window_bounds = array<i64: 1, 16, 16>}]} {
    %c0 = arith.constant 0 : index
    %c0_0 = arith.constant 0 : index
    %c0_1 = arith.constant 0 : index
    %0 = vector.load %arg1[%c0, %c0_0, %c0_1] : memref<1x8x64xf32, #tpu.memory_space<vmem>>, vector<1x8x64xf32>
    %1 = vector.shape_cast %0 : vector<1x8x64xf32> to vector<8x64xf32>
    %c0_2 = arith.constant 0 : index
    %c0_3 = arith.constant 0 : index
    %2 = vector.load %arg2[%c0_2, %c0_3] : memref<16x8xf32, #tpu.memory_space<vmem>>, vector<16x8xf32>
    %cst = arith.constant dense<0.000000e+00> : vector<16x64xf32>
    %3 = tpu.matmul %2, %1, %cst {dimension_numbers = #tpu.dot_dimension_numbers<[1], [0], [0], [1], [0, 0, 1, 1], [], []>} : vector<16x8xf32>, vector<8x64xf32>, vector<16x64xf32> -> vector<16x64xf32>
    %c0_4 = arith.constant 0 : index
    %c0_5 = arith.constant 0 : index
    %4 = vector.load %arg3[%c0_4, %c0_5] : memref<16x1xf32, #tpu.memory_space<vmem>>, vector<16x1xf32>
    %5 = vector.broadcast %4 : vector<16x1xf32> to vector<16x64xf32>
    %6 = arith.addf %3, %5 : vector<16x64xf32>
    %cst_6 = arith.constant 0.000000e+00 : f32
    %7 = vector.broadcast %cst_6 : f32 to vector<16x64xf32>
    %8 = arith.maximumf %6, %7 : vector<16x64xf32>
    %c0_7 = arith.constant 0 : index
    %c0_8 = arith.constant 0 : index
    %c0_9 = arith.constant 0 : index
    %9 = vector.load %arg5[%c0_7, %c0_8, %c0_9] : memref<1x16x64xf32, #tpu.memory_space<vmem>>, vector<1x16x64xf32>
    %10 = vector.shape_cast %9 : vector<1x16x64xf32> to vector<16x64xf32>
    %11 = vector.shape_cast %8 : vector<16x64xf32> to vector<1x16x64xf32>
    tpu.vector_store %arg5[%c0_7, %c0_8, %c0_9], %11 {strides = array<i32>} : memref<1x16x64xf32, #tpu.memory_space<vmem>>, vector<1x16x64xf32>,
    %c0_10 = arith.constant 0 : index
    %c0_11 = arith.constant 0 : index
    %12 = vector.load %arg4[%c0_10, %c0_11] : memref<64x16xf32, #tpu.memory_space<vmem>>, vector<64x16xf32>
    %cst_12 = arith.constant dense<0.000000e+00> : vector<16x16xf32>
    %13 = tpu.matmul %8, %12, %cst_12 {dimension_numbers = #tpu.dot_dimension_numbers<[1], [0], [0], [1], [0, 0, 1, 1], [], []>} : vector<16x64xf32>, vector<64x16xf32>, vector<16x16xf32> -> vector<16x16xf32>
    %c0_13 = arith.constant 0 : index
    %c0_14 = arith.constant 0 : index
    %c0_15 = arith.constant 0 : index
    %14 = vector.load %arg6[%c0_13, %c0_14, %c0_15] : memref<1x16x16xf32, #tpu.memory_space<vmem>>, vector<1x16x16xf32>
    %15 = vector.shape_cast %14 : vector<1x16x16xf32> to vector<16x16xf32>
    %16 = vector.shape_cast %13 : vector<16x16xf32> to vector<1x16x16xf32>
    tpu.vector_store %arg6[%c0_13, %c0_14, %c0_15], %16 {strides = array<i32>} : memref<1x16x16xf32, #tpu.memory_space<vmem>>, vector<1x16x16xf32>,
    return
  }
  func.func @transform_0(%arg0: i32) -> (i32, i32, i32) {
    %c0_i32 = arith.constant 0 : i32
    %c0_i32_0 = arith.constant 0 : i32
    %c0_i32_1 = arith.constant 0 : i32
    return %arg0, %c0_i32, %c0_i32_0 : i32, i32, i32
  }
  func.func @transform_1(%arg0: i32) -> (i32, i32) {
    %c0_i32 = arith.constant 0 : i32
    %c0_i32_0 = arith.constant 0 : i32
    %c0_i32_1 = arith.constant 0 : i32
    return %c0_i32, %c0_i32_0 : i32, i32
  }
  func.func @transform_2(%arg0: i32) -> (i32, i32) {
    %c0_i32 = arith.constant 0 : i32
    %c0_i32_0 = arith.constant 0 : i32
    %c0_i32_1 = arith.constant 0 : i32
    return %c0_i32, %c0_i32_0 : i32, i32
  }
  func.func @transform_3(%arg0: i32) -> (i32, i32) {
    %c0_i32 = arith.constant 0 : i32
    %c0_i32_0 = arith.constant 0 : i32
    %c0_i32_1 = arith.constant 0 : i32
    return %c0_i32, %c0_i32_0 : i32, i32
  }
  func.func @transform_4(%arg0: i32) -> (i32, i32, i32) {
    %c0_i32 = arith.constant 0 : i32
    %c0_i32_0 = arith.constant 0 : i32
    %c0_i32_1 = arith.constant 0 : i32
    return %arg0, %c0_i32, %c0_i32_0 : i32, i32, i32
  }
  func.func @transform_5(%arg0: i32) -> (i32, i32, i32) {
    %c0_i32 = arith.constant 0 : i32
    %c0_i32_0 = arith.constant 0 : i32
    %c0_i32_1 = arith.constant 0 : i32
    return %arg0, %c0_i32, %c0_i32_0 : i32, i32, i32
  }
}

module attributes {stable_mosaic.version = 11 : i64} {
  func.func @_prc_style_kernel(%arg0: i32, %arg1: memref<1x16x64xf32, #tpu.memory_space<vmem>>, %arg2: memref<1x16x64xf32, #tpu.memory_space<vmem>>, %arg3: memref<1x16x64xf32, #tpu.memory_space<vmem>>, %arg4: memref<1x2xf32, #tpu.memory_space<smem>>) attributes {dimension_semantics = [#tpu.dimension_semantics<arbitrary>], iteration_bounds = array<i64: 2>, scalar_prefetch = 0 : i64, scratch_operands = 0 : i64, tpu.core_type = #tpu.core_type<tc>, window_params = [{transform_indices = @transform_0, window_bounds = array<i64: 1, 16, 64>}, {transform_indices = @transform_1, window_bounds = array<i64: 1, 16, 64>}, {transform_indices = @transform_2, window_bounds = array<i64: 1, 16, 64>}, {transform_indices = @transform_3, window_bounds = array<i64: 1, 2>}]} {
    %c0 = arith.constant 0 : index
    %c0_0 = arith.constant 0 : index
    %c0_1 = arith.constant 0 : index
    %0 = vector.load %arg1[%c0, %c0_0, %c0_1] : memref<1x16x64xf32, #tpu.memory_space<vmem>>, vector<1x16x64xf32>
    %1 = vector.shape_cast %0 : vector<1x16x64xf32> to vector<16x64xf32>
    %c0_2 = arith.constant 0 : index
    %c0_3 = arith.constant 0 : index
    %c0_4 = arith.constant 0 : index
    %2 = vector.load %arg2[%c0_2, %c0_3, %c0_4] : memref<1x16x64xf32, #tpu.memory_space<vmem>>, vector<1x16x64xf32>
    %3 = vector.shape_cast %2 : vector<1x16x64xf32> to vector<16x64xf32>
    %c0_5 = arith.constant 0 : index
    %c0_6 = arith.constant 0 : index
    %c0_7 = arith.constant 0 : index
    %4 = vector.load %arg3[%c0_5, %c0_6, %c0_7] : memref<1x16x64xf32, #tpu.memory_space<vmem>>, vector<1x16x64xf32>
    %5 = vector.shape_cast %4 : vector<1x16x64xf32> to vector<16x64xf32>
    %6 = arith.subf %3, %5 : vector<16x64xf32>
    %7 = math.absf %6 : vector<16x64xf32>
    %8 = vector.shape_cast %7 : vector<16x64xf32> to vector<1x16x64xf32>
    %cst = arith.constant dense<0.000000e+00> : vector<1xf32>
    %9 = vector.multi_reduction <add>, %8, %cst [1, 2] : vector<1x16x64xf32> to vector<1xf32>
    %10 = vector.shape_cast %9 : vector<1xf32> to vector<1x1x1xf32>
    %11 = vector.extract %10[0, 0, 0] : f32 from vector<1x1x1xf32>
    %12 = arith.subf %1, %5 : vector<16x64xf32>
    %13 = math.absf %12 : vector<16x64xf32>
    %14 = vector.shape_cast %13 : vector<16x64xf32> to vector<1x16x64xf32>
    %cst_8 = arith.constant dense<0.000000e+00> : vector<1xf32>
    %15 = vector.multi_reduction <add>, %14, %cst_8 [1, 2] : vector<1x16x64xf32> to vector<1xf32>
    %16 = vector.shape_cast %15 : vector<1xf32> to vector<1x1x1xf32>
    %17 = vector.extract %16[0, 0, 0] : f32 from vector<1x1x1xf32>
    %18 = arith.addf %11, %17 : f32
    %cst_9 = arith.constant dense<0.000000e+00> : vector<16x16xf32>
    %19 = tpu.matmul %3, %3, %cst_9 {dimension_numbers = #tpu.dot_dimension_numbers<[1], [1], [0], [0], [0, 0, 1, 0], [], []>} : vector<16x64xf32>, vector<16x64xf32>, vector<16x16xf32> -> vector<16x16xf32>
    %cst_10 = arith.constant 9.765625E-4 : f32
    %20 = vector.broadcast %cst_10 : f32 to vector<16x16xf32>
    %21 = arith.mulf %19, %20 : vector<16x16xf32>
    %cst_11 = arith.constant dense<0.000000e+00> : vector<16x16xf32>
    %22 = tpu.matmul %1, %1, %cst_11 {dimension_numbers = #tpu.dot_dimension_numbers<[1], [1], [0], [0], [0, 0, 1, 0], [], []>} : vector<16x64xf32>, vector<16x64xf32>, vector<16x16xf32> -> vector<16x16xf32>
    %cst_12 = arith.constant 9.765625E-4 : f32
    %23 = vector.broadcast %cst_12 : f32 to vector<16x16xf32>
    %24 = arith.mulf %22, %23 : vector<16x16xf32>
    %cst_13 = arith.constant dense<0.000000e+00> : vector<16x16xf32>
    %25 = tpu.matmul %5, %5, %cst_13 {dimension_numbers = #tpu.dot_dimension_numbers<[1], [1], [0], [0], [0, 0, 1, 0], [], []>} : vector<16x64xf32>, vector<16x64xf32>, vector<16x16xf32> -> vector<16x16xf32>
    %cst_14 = arith.constant 9.765625E-4 : f32
    %26 = vector.broadcast %cst_14 : f32 to vector<16x16xf32>
    %27 = arith.mulf %25, %26 : vector<16x16xf32>
    %28 = arith.subf %21, %27 : vector<16x16xf32>
    %29 = math.absf %28 : vector<16x16xf32>
    %30 = vector.shape_cast %29 : vector<16x16xf32> to vector<1x16x16xf32>
    %cst_15 = arith.constant dense<0.000000e+00> : vector<1xf32>
    %31 = vector.multi_reduction <add>, %30, %cst_15 [1, 2] : vector<1x16x16xf32> to vector<1xf32>
    %32 = vector.shape_cast %31 : vector<1xf32> to vector<1x1x1xf32>
    %33 = vector.extract %32[0, 0, 0] : f32 from vector<1x1x1xf32>
    %34 = arith.subf %24, %27 : vector<16x16xf32>
    %35 = math.absf %34 : vector<16x16xf32>
    %36 = vector.shape_cast %35 : vector<16x16xf32> to vector<1x16x16xf32>
    %cst_16 = arith.constant dense<0.000000e+00> : vector<1xf32>
    %37 = vector.multi_reduction <add>, %36, %cst_16 [1, 2] : vector<1x16x16xf32> to vector<1xf32>
    %38 = vector.shape_cast %37 : vector<1xf32> to vector<1x1x1xf32>
    %39 = vector.extract %38[0, 0, 0] : f32 from vector<1x1x1xf32>
    %40 = arith.addf %33, %39 : f32
    %c0_i32 = arith.constant 0 : i32
    %41 = arith.cmpi eq, %arg0, %c0_i32 : i32
    %42 = arith.extui %41 : i1 to i32
    %c0_i32_17 = arith.constant 0 : i32
    %43 = arith.cmpi ne, %42, %c0_i32_17 : i32
    scf.if %43 {
      %cst_26 = arith.constant 0.000000e+00 : f32
      %c0_27 = arith.constant 0 : index
      %c0_28 = arith.constant 0 : index
      %53 = memref.load %arg4[%c0_27, %c0_28] : memref<1x2xf32, #tpu.memory_space<smem>>
      memref.store %cst_26, %arg4[%c0_27, %c0_28] : memref<1x2xf32, #tpu.memory_space<smem>>
      %cst_29 = arith.constant 0.000000e+00 : f32
      %c0_30 = arith.constant 0 : index
      %c1_31 = arith.constant 1 : index
      %54 = memref.load %arg4[%c0_30, %c1_31] : memref<1x2xf32, #tpu.memory_space<smem>>
      memref.store %cst_29, %arg4[%c0_30, %c1_31] : memref<1x2xf32, #tpu.memory_space<smem>>
    } else {
    }
    %c0_18 = arith.constant 0 : index
    %c0_19 = arith.constant 0 : index
    %44 = memref.load %arg4[%c0_18, %c0_19] : memref<1x2xf32, #tpu.memory_space<smem>>
    %45 = arith.addf %44, %18 : f32
    %c0_20 = arith.constant 0 : index
    %c0_21 = arith.constant 0 : index
    %46 = memref.load %arg4[%c0_20, %c0_21] : memref<1x2xf32, #tpu.memory_space<smem>>
    memref.store %45, %arg4[%c0_20, %c0_21] : memref<1x2xf32, #tpu.memory_space<smem>>
    %c0_22 = arith.constant 0 : index
    %c1 = arith.constant 1 : index
    %47 = memref.load %arg4[%c0_22, %c1] : memref<1x2xf32, #tpu.memory_space<smem>>
    %48 = arith.addf %47, %40 : f32
    %c0_23 = arith.constant 0 : index
    %c1_24 = arith.constant 1 : index
    %49 = memref.load %arg4[%c0_23, %c1_24] : memref<1x2xf32, #tpu.memory_space<smem>>
    memref.store %48, %arg4[%c0_23, %c1_24] : memref<1x2xf32, #tpu.memory_space<smem>>
    %c1_i32 = arith.constant 1 : i32
    %50 = arith.cmpi eq, %arg0, %c1_i32 : i32
    %51 = arith.extui %50 : i1 to i32
    %c0_i32_25 = arith.constant 0 : i32
    %52 = arith.cmpi ne, %51, %c0_i32_25 : i32
    scf.if %52 {
      %c0_26 = arith.constant 0 : index
      %c0_27 = arith.constant 0 : index
      %53 = memref.load %arg4[%c0_26, %c0_27] : memref<1x2xf32, #tpu.memory_space<smem>>
      %cst_28 = arith.constant 4.8828125E-4 : f32
      %54 = arith.mulf %53, %cst_28 : f32
      %c0_29 = arith.constant 0 : index
      %c0_30 = arith.constant 0 : index
      %55 = memref.load %arg4[%c0_29, %c0_30] : memref<1x2xf32, #tpu.memory_space<smem>>
      memref.store %54, %arg4[%c0_29, %c0_30] : memref<1x2xf32, #tpu.memory_space<smem>>
      %c0_31 = arith.constant 0 : index
      %c1_32 = arith.constant 1 : index
      %56 = memref.load %arg4[%c0_31, %c1_32] : memref<1x2xf32, #tpu.memory_space<smem>>
      %cst_33 = arith.constant 0.001953125 : f32
      %57 = arith.mulf %56, %cst_33 : f32
      %c0_34 = arith.constant 0 : index
      %c1_35 = arith.constant 1 : index
      %58 = memref.load %arg4[%c0_34, %c1_35] : memref<1x2xf32, #tpu.memory_space<smem>>
      memref.store %57, %arg4[%c0_34, %c1_35] : memref<1x2xf32, #tpu.memory_space<smem>>
    } else {
    }
    return
  }
  func.func @transform_0(%arg0: i32) -> (i32, i32, i32) {
    %c0_i32 = arith.constant 0 : i32
    %c0_i32_0 = arith.constant 0 : i32
    %c0_i32_1 = arith.constant 0 : i32
    return %arg0, %c0_i32, %c0_i32_0 : i32, i32, i32
  }
  func.func @transform_1(%arg0: i32) -> (i32, i32, i32) {
    %c2_i32 = arith.constant 2 : i32
    %0 = arith.addi %arg0, %c2_i32 : i32
    %c0_i32 = arith.constant 0 : i32
    %c0_i32_0 = arith.constant 0 : i32
    %c0_i32_1 = arith.constant 0 : i32
    return %0, %c0_i32, %c0_i32_0 : i32, i32, i32
  }
  func.func @transform_2(%arg0: i32) -> (i32, i32, i32) {
    %c4_i32 = arith.constant 4 : i32
    %0 = arith.addi %arg0, %c4_i32 : i32
    %c0_i32 = arith.constant 0 : i32
    %c0_i32_0 = arith.constant 0 : i32
    %c0_i32_1 = arith.constant 0 : i32
    return %0, %c0_i32, %c0_i32_0 : i32, i32, i32
  }
  func.func @transform_3(%arg0: i32) -> (i32, i32) {
    %c0_i32 = arith.constant 0 : i32
    %c0_i32_0 = arith.constant 0 : i32
    %c0_i32_1 = arith.constant 0 : i32
    return %c0_i32, %c0_i32_0 : i32, i32
  }
}

module attributes {stable_mosaic.version = 11 : i64} {
  func.func @_conv_relu_kernel(%arg0: i32, %arg1: memref<1x16x16xf32, #tpu.memory_space<vmem>>, %arg2: memref<32x16xf32, #tpu.memory_space<vmem>>, %arg3: memref<32x1xf32, #tpu.memory_space<vmem>>, %arg4: memref<1x32x16xf32, #tpu.memory_space<vmem>>) attributes {dimension_semantics = [#tpu.dimension_semantics<parallel>], iteration_bounds = array<i64: 6>, scalar_prefetch = 0 : i64, scratch_operands = 0 : i64, tpu.core_type = #tpu.core_type<tc>, window_params = [{transform_indices = @transform_0, window_bounds = array<i64: 1, 16, 16>}, {pipeline_mode = #tpu.pipeline_mode<synchronous>, transform_indices = @transform_1, window_bounds = array<i64: 32, 16>}, {pipeline_mode = #tpu.pipeline_mode<synchronous>, transform_indices = @transform_2, window_bounds = array<i64: 32, 1>}, {transform_indices = @transform_3, window_bounds = array<i64: 1, 32, 16>}]} {
    %c0 = arith.constant 0 : index
    %c0_0 = arith.constant 0 : index
    %c0_1 = arith.constant 0 : index
    %0 = vector.load %arg1[%c0, %c0_0, %c0_1] : memref<1x16x16xf32, #tpu.memory_space<vmem>>, vector<1x16x16xf32>
    %1 = vector.shape_cast %0 : vector<1x16x16xf32> to vector<16x16xf32>
    %c0_2 = arith.constant 0 : index
    %c0_3 = arith.constant 0 : index
    %2 = vector.load %arg2[%c0_2, %c0_3] : memref<32x16xf32, #tpu.memory_space<vmem>>, vector<32x16xf32>
    %cst = arith.constant dense<0.000000e+00> : vector<32x16xf32>
    %3 = tpu.matmul %2, %1, %cst {dimension_numbers = #tpu.dot_dimension_numbers<[1], [0], [0], [1], [0, 0, 1, 1], [], []>} : vector<32x16xf32>, vector<16x16xf32>, vector<32x16xf32> -> vector<32x16xf32>
    %c0_4 = arith.constant 0 : index
    %c0_5 = arith.constant 0 : index
    %4 = vector.load %arg3[%c0_4, %c0_5] : memref<32x1xf32, #tpu.memory_space<vmem>>, vector<32x1xf32>
    %5 = vector.broadcast %4 : vector<32x1xf32> to vector<32x16xf32>
    %6 = arith.addf %3, %5 : vector<32x16xf32>
    %cst_6 = arith.constant 0.000000e+00 : f32
    %7 = vector.broadcast %cst_6 : f32 to vector<32x16xf32>
    %8 = arith.maximumf %6, %7 : vector<32x16xf32>
    %c0_7 = arith.constant 0 : index
    %c0_8 = arith.constant 0 : index
    %c0_9 = arith.constant 0 : index
    %9 = vector.load %arg4[%c0_7, %c0_8, %c0_9] : memref<1x32x16xf32, #tpu.memory_space<vmem>>, vector<1x32x16xf32>
    %10 = vector.shape_cast %9 : vector<1x32x16xf32> to vector<32x16xf32>
    %11 = vector.shape_cast %8 : vector<32x16xf32> to vector<1x32x16xf32>
    tpu.vector_store %arg4[%c0_7, %c0_8, %c0_9], %11 {strides = array<i32>} : memref<1x32x16xf32, #tpu.memory_space<vmem>>, vector<1x32x16xf32>,
    return
  }
  func.func @transform_0(%arg0: i32) -> (i32, i32, i32) {
    %c0_i32 = arith.constant 0 : i32
    %c0_i32_0 = arith.constant 0 : i32
    %c0_i32_1 = arith.constant 0 : i32
    return %arg0, %c0_i32, %c0_i32_0 : i32, i32, i32
  }
  func.func @transform_1(%arg0: i32) -> (i32, i32) {
    %c0_i32 = arith.constant 0 : i32
    %c0_i32_0 = arith.constant 0 : i32
    %c0_i32_1 = arith.constant 0 : i32
    return %c0_i32, %c0_i32_0 : i32, i32
  }
  func.func @transform_2(%arg0: i32) -> (i32, i32) {
    %c0_i32 = arith.constant 0 : i32
    %c0_i32_0 = arith.constant 0 : i32
    %c0_i32_1 = arith.constant 0 : i32
    return %c0_i32, %c0_i32_0 : i32, i32
  }
  func.func @transform_3(%arg0: i32) -> (i32, i32, i32) {
    %c0_i32 = arith.constant 0 : i32
    %c0_i32_0 = arith.constant 0 : i32
    %c0_i32_1 = arith.constant 0 : i32
    return %arg0, %c0_i32, %c0_i32_0 : i32, i32, i32
  }
}

module attributes {stable_mosaic.version = 11 : i64} {
  func.func @_prc_style_kernel(%arg0: i32, %arg1: memref<1x32x16xf32, #tpu.memory_space<vmem>>, %arg2: memref<1x32x16xf32, #tpu.memory_space<vmem>>, %arg3: memref<1x32x16xf32, #tpu.memory_space<vmem>>, %arg4: memref<1x2xf32, #tpu.memory_space<smem>>) attributes {dimension_semantics = [#tpu.dimension_semantics<arbitrary>], iteration_bounds = array<i64: 2>, scalar_prefetch = 0 : i64, scratch_operands = 0 : i64, tpu.core_type = #tpu.core_type<tc>, window_params = [{transform_indices = @transform_0, window_bounds = array<i64: 1, 32, 16>}, {transform_indices = @transform_1, window_bounds = array<i64: 1, 32, 16>}, {transform_indices = @transform_2, window_bounds = array<i64: 1, 32, 16>}, {transform_indices = @transform_3, window_bounds = array<i64: 1, 2>}]} {
    %c0 = arith.constant 0 : index
    %c0_0 = arith.constant 0 : index
    %c0_1 = arith.constant 0 : index
    %0 = vector.load %arg1[%c0, %c0_0, %c0_1] : memref<1x32x16xf32, #tpu.memory_space<vmem>>, vector<1x32x16xf32>
    %1 = vector.shape_cast %0 : vector<1x32x16xf32> to vector<32x16xf32>
    %c0_2 = arith.constant 0 : index
    %c0_3 = arith.constant 0 : index
    %c0_4 = arith.constant 0 : index
    %2 = vector.load %arg2[%c0_2, %c0_3, %c0_4] : memref<1x32x16xf32, #tpu.memory_space<vmem>>, vector<1x32x16xf32>
    %3 = vector.shape_cast %2 : vector<1x32x16xf32> to vector<32x16xf32>
    %c0_5 = arith.constant 0 : index
    %c0_6 = arith.constant 0 : index
    %c0_7 = arith.constant 0 : index
    %4 = vector.load %arg3[%c0_5, %c0_6, %c0_7] : memref<1x32x16xf32, #tpu.memory_space<vmem>>, vector<1x32x16xf32>
    %5 = vector.shape_cast %4 : vector<1x32x16xf32> to vector<32x16xf32>
    %6 = arith.subf %3, %5 : vector<32x16xf32>
    %7 = math.absf %6 : vector<32x16xf32>
    %8 = vector.shape_cast %7 : vector<32x16xf32> to vector<1x32x16xf32>
    %cst = arith.constant dense<0.000000e+00> : vector<1xf32>
    %9 = vector.multi_reduction <add>, %8, %cst [1, 2] : vector<1x32x16xf32> to vector<1xf32>
    %10 = vector.shape_cast %9 : vector<1xf32> to vector<1x1x1xf32>
    %11 = vector.extract %10[0, 0, 0] : f32 from vector<1x1x1xf32>
    %12 = arith.subf %1, %5 : vector<32x16xf32>
    %13 = math.absf %12 : vector<32x16xf32>
    %14 = vector.shape_cast %13 : vector<32x16xf32> to vector<1x32x16xf32>
    %cst_8 = arith.constant dense<0.000000e+00> : vector<1xf32>
    %15 = vector.multi_reduction <add>, %14, %cst_8 [1, 2] : vector<1x32x16xf32> to vector<1xf32>
    %16 = vector.shape_cast %15 : vector<1xf32> to vector<1x1x1xf32>
    %17 = vector.extract %16[0, 0, 0] : f32 from vector<1x1x1xf32>
    %18 = arith.addf %11, %17 : f32
    %cst_9 = arith.constant dense<0.000000e+00> : vector<32x32xf32>
    %19 = tpu.matmul %3, %3, %cst_9 {dimension_numbers = #tpu.dot_dimension_numbers<[1], [1], [0], [0], [0, 0, 1, 0], [], []>} : vector<32x16xf32>, vector<32x16xf32>, vector<32x32xf32> -> vector<32x32xf32>
    %cst_10 = arith.constant 0.001953125 : f32
    %20 = vector.broadcast %cst_10 : f32 to vector<32x32xf32>
    %21 = arith.mulf %19, %20 : vector<32x32xf32>
    %cst_11 = arith.constant dense<0.000000e+00> : vector<32x32xf32>
    %22 = tpu.matmul %1, %1, %cst_11 {dimension_numbers = #tpu.dot_dimension_numbers<[1], [1], [0], [0], [0, 0, 1, 0], [], []>} : vector<32x16xf32>, vector<32x16xf32>, vector<32x32xf32> -> vector<32x32xf32>
    %cst_12 = arith.constant 0.001953125 : f32
    %23 = vector.broadcast %cst_12 : f32 to vector<32x32xf32>
    %24 = arith.mulf %22, %23 : vector<32x32xf32>
    %cst_13 = arith.constant dense<0.000000e+00> : vector<32x32xf32>
    %25 = tpu.matmul %5, %5, %cst_13 {dimension_numbers = #tpu.dot_dimension_numbers<[1], [1], [0], [0], [0, 0, 1, 0], [], []>} : vector<32x16xf32>, vector<32x16xf32>, vector<32x32xf32> -> vector<32x32xf32>
    %cst_14 = arith.constant 0.001953125 : f32
    %26 = vector.broadcast %cst_14 : f32 to vector<32x32xf32>
    %27 = arith.mulf %25, %26 : vector<32x32xf32>
    %28 = arith.subf %21, %27 : vector<32x32xf32>
    %29 = math.absf %28 : vector<32x32xf32>
    %30 = vector.shape_cast %29 : vector<32x32xf32> to vector<1x32x32xf32>
    %cst_15 = arith.constant dense<0.000000e+00> : vector<1xf32>
    %31 = vector.multi_reduction <add>, %30, %cst_15 [1, 2] : vector<1x32x32xf32> to vector<1xf32>
    %32 = vector.shape_cast %31 : vector<1xf32> to vector<1x1x1xf32>
    %33 = vector.extract %32[0, 0, 0] : f32 from vector<1x1x1xf32>
    %34 = arith.subf %24, %27 : vector<32x32xf32>
    %35 = math.absf %34 : vector<32x32xf32>
    %36 = vector.shape_cast %35 : vector<32x32xf32> to vector<1x32x32xf32>
    %cst_16 = arith.constant dense<0.000000e+00> : vector<1xf32>
    %37 = vector.multi_reduction <add>, %36, %cst_16 [1, 2] : vector<1x32x32xf32> to vector<1xf32>
    %38 = vector.shape_cast %37 : vector<1xf32> to vector<1x1x1xf32>
    %39 = vector.extract %38[0, 0, 0] : f32 from vector<1x1x1xf32>
    %40 = arith.addf %33, %39 : f32
    %c0_i32 = arith.constant 0 : i32
    %41 = arith.cmpi eq, %arg0, %c0_i32 : i32
    %42 = arith.extui %41 : i1 to i32
    %c0_i32_17 = arith.constant 0 : i32
    %43 = arith.cmpi ne, %42, %c0_i32_17 : i32
    scf.if %43 {
      %cst_26 = arith.constant 0.000000e+00 : f32
      %c0_27 = arith.constant 0 : index
      %c0_28 = arith.constant 0 : index
      %53 = memref.load %arg4[%c0_27, %c0_28] : memref<1x2xf32, #tpu.memory_space<smem>>
      memref.store %cst_26, %arg4[%c0_27, %c0_28] : memref<1x2xf32, #tpu.memory_space<smem>>
      %cst_29 = arith.constant 0.000000e+00 : f32
      %c0_30 = arith.constant 0 : index
      %c1_31 = arith.constant 1 : index
      %54 = memref.load %arg4[%c0_30, %c1_31] : memref<1x2xf32, #tpu.memory_space<smem>>
      memref.store %cst_29, %arg4[%c0_30, %c1_31] : memref<1x2xf32, #tpu.memory_space<smem>>
    } else {
    }
    %c0_18 = arith.constant 0 : index
    %c0_19 = arith.constant 0 : index
    %44 = memref.load %arg4[%c0_18, %c0_19] : memref<1x2xf32, #tpu.memory_space<smem>>
    %45 = arith.addf %44, %18 : f32
    %c0_20 = arith.constant 0 : index
    %c0_21 = arith.constant 0 : index
    %46 = memref.load %arg4[%c0_20, %c0_21] : memref<1x2xf32, #tpu.memory_space<smem>>
    memref.store %45, %arg4[%c0_20, %c0_21] : memref<1x2xf32, #tpu.memory_space<smem>>
    %c0_22 = arith.constant 0 : index
    %c1 = arith.constant 1 : index
    %47 = memref.load %arg4[%c0_22, %c1] : memref<1x2xf32, #tpu.memory_space<smem>>
    %48 = arith.addf %47, %40 : f32
    %c0_23 = arith.constant 0 : index
    %c1_24 = arith.constant 1 : index
    %49 = memref.load %arg4[%c0_23, %c1_24] : memref<1x2xf32, #tpu.memory_space<smem>>
    memref.store %48, %arg4[%c0_23, %c1_24] : memref<1x2xf32, #tpu.memory_space<smem>>
    %c1_i32 = arith.constant 1 : i32
    %50 = arith.cmpi eq, %arg0, %c1_i32 : i32
    %51 = arith.extui %50 : i1 to i32
    %c0_i32_25 = arith.constant 0 : i32
    %52 = arith.cmpi ne, %51, %c0_i32_25 : i32
    scf.if %52 {
      %c0_26 = arith.constant 0 : index
      %c0_27 = arith.constant 0 : index
      %53 = memref.load %arg4[%c0_26, %c0_27] : memref<1x2xf32, #tpu.memory_space<smem>>
      %cst_28 = arith.constant 9.765625E-4 : f32
      %54 = arith.mulf %53, %cst_28 : f32
      %c0_29 = arith.constant 0 : index
      %c0_30 = arith.constant 0 : index
      %55 = memref.load %arg4[%c0_29, %c0_30] : memref<1x2xf32, #tpu.memory_space<smem>>
      memref.store %54, %arg4[%c0_29, %c0_30] : memref<1x2xf32, #tpu.memory_space<smem>>
      %c0_31 = arith.constant 0 : index
      %c1_32 = arith.constant 1 : index
      %56 = memref.load %arg4[%c0_31, %c1_32] : memref<1x2xf32, #tpu.memory_space<smem>>
      %cst_33 = arith.constant 4.8828125E-4 : f32
      %57 = arith.mulf %56, %cst_33 : f32
      %c0_34 = arith.constant 0 : index
      %c1_35 = arith.constant 1 : index
      %58 = memref.load %arg4[%c0_34, %c1_35] : memref<1x2xf32, #tpu.memory_space<smem>>
      memref.store %57, %arg4[%c0_34, %c1_35] : memref<1x2xf32, #tpu.memory_space<smem>>
    } else {
    }
    return
  }
  func.func @transform_0(%arg0: i32) -> (i32, i32, i32) {
    %c0_i32 = arith.constant 0 : i32
    %c0_i32_0 = arith.constant 0 : i32
    %c0_i32_1 = arith.constant 0 : i32
    return %arg0, %c0_i32, %c0_i32_0 : i32, i32, i32
  }
  func.func @transform_1(%arg0: i32) -> (i32, i32, i32) {
    %c2_i32 = arith.constant 2 : i32
    %0 = arith.addi %arg0, %c2_i32 : i32
    %c0_i32 = arith.constant 0 : i32
    %c0_i32_0 = arith.constant 0 : i32
    %c0_i32_1 = arith.constant 0 : i32
    return %0, %c0_i32, %c0_i32_0 : i32, i32, i32
  }
  func.func @transform_2(%arg0: i32) -> (i32, i32, i32) {
    %c4_i32 = arith.constant 4 : i32
    %0 = arith.addi %arg0, %c4_i32 : i32
    %c0_i32 = arith.constant 0 : i32
    %c0_i32_0 = arith.constant 0 : i32
    %c0_i32_1 = arith.constant 0 : i32
    return %0, %c0_i32, %c0_i32_0 : i32, i32, i32
  }
  func.func @transform_3(%arg0: i32) -> (i32, i32) {
    %c0_i32 = arith.constant 0 : i32
    %c0_i32_0 = arith.constant 0 : i32
    %c0_i32_1 = arith.constant 0 : i32
    return %c0_i32, %c0_i32_0 : i32, i32
  }
}

</mosaic_0001>

<bundles_post_ra>
// kernel: inpainting_loss.9
= control target key start
LH: loop header
LB: loop body
LE: loop exit
PB: predicated region body
PF: predicated region fallthrough
CT: control target
= control target key end

     0   :  { %s92_s0 = inlined_call_operand.vmem [shape: f32[2,32], index: 0, kind: input, shape index: {}]   ;;  %s93_s1 = inlined_call_operand.vmem [shape: f32[2,32], index: 1, kind: input, shape index: {}]   ;;  %s94_s2 = inlined_call_operand.hbm [shape: f32[1,1], index: 2, kind: output, shape index: {}]  }
   0x1   :  { %v12_v0 = vld [vmem:[%s92_s0] sm:$0x3] }
   0x2   :  { %v13_v1 = vld [vmem:[%s93_s1] sm:$0x3] }
   0x3   :  { %v14_v2 = vsub.f32 %v12_v0, %v13_v1 }
   0x4   :  { %7 = vsyncpa [#allocation3], 0  ;;  %vm16_vm0 = vcmask 254976   ;;  %s46_s1 = scalar_lea.hbm %s94_s2, 16 }
   0x5   :  { %v15_v3 = vand.u32 2147483647, %v14_v2  ;;  %p47_p0 = scmp.ne.s32.totalorder %s94_s2, %s46_s1  ;;  %p50_p1 = scmp.lt.u32.totalorder %s46_s1, %s94_s2 }
   0x7   :  { %v17_v4 = vsel %vm16_vm0, %v15_v3, 0.0  ;;  %p52_p2 = pnand %p50_p1, %p47_p0 }
   0x8   :  { %18 = vadd.xlane.f32.xlu0 %v17_v4 }
  0x95   :  { %v19_v5 = vpop.xlane.xlu0 %18 }
  0x96   :  { %v20_v6 = vrot.slane %v19_v5, 4 }
  0x98   :  { %v21_v7 = vadd.f32 %v20_v6, %v19_v5 }
  0x9a   :  { %v22_v8 = vrot.slane %v21_v7, 2 }
  0x9c   :  { %v23_v9 = vadd.f32 %v22_v8, %v21_v7 }
  0x9e   :  { %v24_v10 = vrot.slane %v23_v9, 1 }
  0xa0   :  { %v25_v11 = vadd.f32 %v24_v10, %v23_v9 }
  0xa2   :  { %43 = vpush %v25_v11 }
  0xd3   :  { %s44_s13 = spop %43 }
  0xd4   :  { %s27_s0 = smul.f32 0.015625, %s44_s13 }
  0xd6   :  { %29 = sst [smem:[#allocation2]] %s27_s0 }
  0xd7   :  { %55 = shalt.err (!%p52_p2)
}
  0xd8   :  { %s58_s20 = smov [#allocation2]  }
  0xd9   :  { %37 = dma.smem_to_hbm %s58_s20, 16, %s94_s2, [#allocation3]  }
  0xda   :  { %56 = dma.done.wait [#allocation3], 16  }
  0xdb   :  { %57 = vsyncadd [#allocation3], 4294967280 }
  0xdc   :  { %41 = sfence }
  0xdd   :  { %42 = vsyncpa [#allocation3], 1 }

// kernel: inpainting_loss.10
= control target key start
LH: loop header
LB: loop body
LE: loop exit
PB: predicated region body
PF: predicated region fallthrough
CT: control target
= control target key end

     0   :  { %s656_s18 = smov 0   ;;  %s786_s0 = inlined_call_operand.vmem [shape: f32[6,3,256], index: 0, kind: input, shape index: {}]   ;;  %s787_s1 = inlined_call_operand.vmem [shape: f32[8,3], index: 1, kind: input, shape index: {}]   ;;  %s788_s2 = inlined_call_operand.vmem [shape: f32[8,1], index: 2, kind: input, shape index: {}]   ;;  %s789_s3 = inlined_call_operand.vmem [shape: f32[256,64], index: 3, kind: input, shape index: {}]   ;;  %s790_s4 = inlined_call_operand.vmem [shape: f32[6,8,256], index: 4, kind: output, shape index: {0}]   ;;  %s791_s5 = inlined_call_operand.vmem [shape: f32[6,8,64], index: 5, kind: output, shape index: {1}]  }
   0x1 LB: > { %s520_s19 = sadd.s32 4294967295, %s622_s18   ;;  %p524_p0 = scmp.ge.s32.totalorder %s622_s18, 1  ;;  %s622_s18 = sphi %s656_s18, %s16_s18  }
   0x2   : > { %p190_p1 = scmp.lt.s32.totalorder %s622_s18, 7 }
   0x4   : > { %p191_p2 = pnand %p524_p0, %p190_p1 }
   0x5   : > { %p222_p3 = scmp.lt.s32.totalorder (!%p191_p2), %s520_s19, 5  ;;  %v624_v0 = vmov (!%p191_p2), 0.0   ;;  %v625_v1 = vmov (!%p191_p2), 0   ;;  %v238_v2 = vld [vmem:[%s788_s2] sm:$0xff] (!%p191_p2)  ;;  %v347_v4 = vld [vmem:[%s789_s3 + $0x88] sm:$0xff] (!%p191_p2)  ;;  %v348_v8 = vld [vmem:[%s789_s3 + $0x90] sm:$0xff] (!%p191_p2) }
   0x6   : > { %194 = sbr.rel (%p191_p2) target bundleno = 455 (0x1c7), region = 36  ;;  %319 = vmatprep.mubr.f32.mxu0 (!%p191_p2), %v624_v0  ;;  %614 = vset.pattern.permute.xlu0 (!%p191_p2), %v625_v1  ;;  %v346_v3 = vld [vmem:[%s789_s3 + $0x80] sm:$0xff] (!%p191_p2)  ;;  %v331_v7 = vld [vmem:[%s789_s3 + $0x8] sm:$0xff] (!%p191_p2)  ;;  %v349_v10 = vld [vmem:[%s789_s3 + $0x98] sm:$0xff] (!%p191_p2)  ;;  %vm250_vm0 = vcmask (!%p191_p2), 1042432   ;;  %vm246_vm1 = vcmask (!%p191_p2), 23552  }
   0x7   : > { %241 = vperm.xlu0 (!%p191_p2), %614, %v238_v2   ;;  %v572_v5 = vpack.c.bf16 (!%p191_p2), %v347_v4, %v346_v3  ;;  %v330_v6 = vld [vmem:[%s789_s3] sm:$0xff] (!%p191_p2)  ;;  %v332_v11 = vld [vmem:[%s789_s3 + $0x10] sm:$0xff] (!%p191_p2)  ;;  %v333_v12 = vld [vmem:[%s789_s3 + $0x18] sm:$0xff] (!%p191_p2)  ;;  %v576_v13 = vpack.c.bf16 (!%p191_p2), %v349_v10, %v348_v8  ;;  %vm432_vm2 = vcmask (!%p191_p2), 523264  }
   0x8   : > { %v574_v9 = vpack.c.bf16 (!%p191_p2), %v331_v7, %v330_v6  ;;  %v350_v14 = vld [vmem:[%s789_s3 + $0xa0] sm:$0xff] (!%p191_p2)  ;;  %v351_v15 = vld [vmem:[%s789_s3 + $0xa8] sm:$0xff] (!%p191_p2)  ;;  %v578_v16 = vpack.c.bf16 (!%p191_p2), %v333_v12, %v332_v11  ;;  %v352_v22 = vld [vmem:[%s789_s3 + $0xb0] sm:$0xff] (!%p191_p2) }
   0x9   : > { %573 = vmatprep.subr.bf16.mxu1 (!%p191_p2), %v572_v5  ;;  %v580_v18 = vpack.c.bf16 (!%p191_p2), %v351_v15, %v350_v14  ;;  %v334_v19 = vld [vmem:[%s789_s3 + $0x20] sm:$0xff] (!%p191_p2)  ;;  %v335_v20 = vld [vmem:[%s789_s3 + $0x28] sm:$0xff] (!%p191_p2)  ;;  %v353_v23 = vld [vmem:[%s789_s3 + $0xb8] sm:$0xff] (!%p191_p2) }
   0xa   : > { %575 = vmatpush3.bf16.msra.mxu1 (!%p191_p2), %v574_v9  ;;  %v237_v24 = vld [vmem:[%s787_s1] sm:$0xff] (!%p191_p2)  ;;  %v582_v25 = vpack.c.bf16 (!%p191_p2), %v335_v20, %v334_v19  ;;  %v584_v26 = vpack.c.bf16 (!%p191_p2), %v353_v23, %v352_v22  ;;  %v336_v27 = vld [vmem:[%s789_s3 + $0x30] sm:$0xff] (!%p191_p2)  ;;  %v337_v28 = vld [vmem:[%s789_s3 + $0x38] sm:$0xff] (!%p191_p2) }
   0xb   : > { %577 = vmatprep.subr.bf16.mxu1 (!%p191_p2), %v576_v13  ;;  %v354_v29 = vld [vmem:[%s789_s3 + $0xc0] sm:$0xff] (!%p191_p2)  ;;  %v355_v30 = vld [vmem:[%s789_s3 + $0xc8] sm:$0xff] (!%p191_p2)  ;;  %v586_v31 = vpack.c.bf16 (!%p191_p2), %v337_v28, %v336_v27  ;;  %v356_v35 = vld [vmem:[%s789_s3 + $0xd0] sm:$0xff] (!%p191_p2) }
   0xc   : > { %v588_v32 = vpack.c.bf16 (!%p191_p2), %v355_v30, %v354_v29  ;;  %v338_v33 = vld [vmem:[%s789_s3 + $0x40] sm:$0xff] (!%p191_p2)  ;;  %v339_v34 = vld [vmem:[%s789_s3 + $0x48] sm:$0xff] (!%p191_p2)  ;;  %v357_v36 = vld [vmem:[%s789_s3 + $0xd8] sm:$0xff] (!%p191_p2) }
   0xd   : > { %s793_s19 = smov (!%p222_p3, %s520_s19), 5  ;;  %v590_v37 = vpack.c.bf16 %v339_v34, %v338_v33  ;;  %v592_v38 = vpack.c.bf16 %v357_v36, %v356_v35  ;;  %v340_v39 = vld [vmem:[%s789_s3 + $0x50] sm:$0xff]  ;;  %v341_v40 = vld [vmem:[%s789_s3 + $0x58] sm:$0xff]  ;;  %v358_v41 = vld [vmem:[%s789_s3 + $0xe0] sm:$0xff] }
   0xe   : > { %s535_s13 = sshll.u32 %s793_s19, 3  ;;  %579 = vmatpush3.bf16.msra.mxu1 %v578_v16  ;;  %v359_v42 = vld [vmem:[%s789_s3 + $0xe8] sm:$0xff]  ;;  %v594_v43 = vpack.c.bf16 %v341_v40, %v340_v39  ;;  %v342_v45 = vld [vmem:[%s789_s3 + $0x60] sm:$0xff]  ;;  %v360_v48 = vld [vmem:[%s789_s3 + $0xf0] sm:$0xff]  ;;  %s536_s25 = sshll.u32 %s793_s19, 4 }
   0xf   : > { %s226_s22 = scalar_lea.vmem %s786_s0, %s535_s13  ;;  %581 = vmatprep.subr.bf16.mxu1 %v580_v18  ;;  %v596_v44 = vpack.c.bf16 %v359_v42, %v358_v41  ;;  %v343_v46 = vld [vmem:[%s789_s3 + $0x68] sm:$0xff]  ;;  %v361_v49 = vld [vmem:[%s789_s3 + $0xf8] sm:$0xff]  ;;  %v344_v51 = vld [vmem:[%s789_s3 + $0x70] sm:$0xff]  ;;  %s231_s28 = scalar_lea.vmem %s790_s4, %s536_s25 }
  0x10   : > { %v236_v17 = vld [vmem:[%s226_s22] sm:$0x77]  ;;  %v598_v47 = vpack.c.bf16 %v343_v46, %v342_v45  ;;  %v600_v50 = vpack.c.bf16 %v361_v49, %v360_v48  ;;  %v345_v52 = vld [vmem:[%s789_s3 + $0x78] sm:$0xff]  ;;  %s235_s6 = scalar_lea.vmem %s791_s5, %s535_s13 }
  0x11   : > { %v245_v21 = vcombine.high %v236_v17, %v236_v17  ;;  %v602_v53 = vpack.c.bf16 %v345_v52, %v344_v51 }
  0x12   : > { %583 = vmatpush3.bf16.msra.mxu1 %v582_v25 }
  0x13   : > { %530 = vmatprep.subr.msk.mxu0 %vm250_vm0, %v245_v21  ;;  %585 = vmatprep.subr.bf16.mxu1 %v584_v26 }
  0x14   : > { %531 = vmatpush1.msk.msra.mxu0 %vm250_vm0, %v236_v17 }
  0x15   : > { %532 = vmatmul.mubr.msk.f32.vlgmr.msra.gmra.mrb[0].mxu0 %vm246_vm1, %v237_v24 }
  0x16   : > { %587 = vmatpush3.bf16.msra.mxu1 %v586_v31 }
  0x17   : > { %589 = vmatprep.subr.bf16.mxu1 %v588_v32 }
  0x1a   : > { %591 = vmatpush3.bf16.msra.mxu1 %v590_v37 }
  0x1b   : > { %593 = vmatprep.subr.bf16.mxu1 %v592_v38 }
  0x1e   : > { %595 = vmatpush3.bf16.msra.mxu1 %v594_v43 }
  0x1f   : > { %597 = vmatprep.subr.bf16.mxu1 %v596_v44 }
  0x22   : > { %599 = vmatpush3.bf16.msra.mxu1 %v598_v47 }
  0x23   : > { %601 = vmatprep.subr.bf16.mxu1 %v600_v50 }
  0x26   : > { %603 = vmatpush3.bf16.msra.mxu1 %v602_v53 }
  0x86   : > { %v242_v54 = vpop.permute.xlu0 %241 }
  0xe8   : > { %v321_v55 = vpop.f32.mrb[0].mxu0 }
  0xe9   : > { %v322_v56 = vadd.f32 %v321_v55, %v242_v54  ;;  %v323_v57 = vpop.f32.mrb[1].mxu0 }
  0xea   : > { %v324_v58 = vadd.f32 %v323_v57, %v242_v54 }
  0xeb   : > { %v326_v59 = vmax.f32 %v322_v56, 0.0 }
  0xec   : > { %v327_v60 = vmax.f32 %v324_v58, 0.0 }
  0xed   : > { %328 = vst [vmem:[%s231_s28] sm:$0xff] %v326_v59 }
  0xee   : > { %329 = vst [vmem:[%s231_s28 + $0x8] sm:$0xff] %v327_v60  ;;  %426 = vmatprep.mubr.f32.mxu1 %v327_v60 }
  0xef   : > { %427 = vmatmul.mubr.f32.vlgmr.msra.gmra.mrb[0].mxu1 %v326_v59 }
 0x1c2   : > { %v569_v61 = vpop.f32.mrb[0].mxu1 }
 0x1c3   : > { %v570_v62 = vpop.f32.mrb[1].mxu1 }
 0x1c4   : > { %v571_v63 = vadd.f32 %v570_v62, %v569_v61 }
 0x1c6   : > { %433 = vst.msk [vmem:[%s235_s6] sm:$0xff] %vm432_vm2, %v571_v63 }
 0x1c7 PF: > { %s16_s18 = sadd.s32 1, %s622_s18  }
 0x1c8   : > { %p13_p4 = scmp.ge.s32.totalorder %s16_s18, 8  }
 0x1ca   :  { %15 = sbr.rel (!%p13_p4) target bundleno = 1 (0x1), region = 78 }

// kernel: inpainting_loss.8
= control target key start
LH: loop header
LB: loop body
LE: loop exit
PB: predicated region body
PF: predicated region fallthrough
CT: control target
= control target key end

     0   :  { %11 = vsyncpa [#allocation3], 0  ;;  %s778_s18 = smov 0   ;;  %s891_s0 = inlined_call_operand.vmem [shape: f32[2,3,256], index: 0, kind: input, shape index: {}]   ;;  %s892_s1 = inlined_call_operand.vmem [shape: f32[2,3,256], index: 1, kind: input, shape index: {}]   ;;  %s893_s2 = inlined_call_operand.vmem [shape: f32[2,3,256], index: 2, kind: input, shape index: {}]   ;;  %s894_s3 = inlined_call_operand.vmem [shape: f32[2,3,256], index: 3, kind: input, shape index: {}]   ;;  %s895_s4 = inlined_call_operand.vmem [shape: f32[2,3,256], index: 4, kind: output, shape index: {0}]   ;;  %s896_s5 = inlined_call_operand.vmem [shape: f32[1,5], index: 5, kind: output, shape index: {1}]  }
   0x1 LB: > { %s784_s19 = sadd.s32 4294967295, %s742_s18   ;;  %p641_p0 = scmp.ge.s32.totalorder %s742_s18, 1  ;;  %s742_s18 = sphi %s778_s18, %s17_s18  }
   0x2   : > { %p216_p1 = scmp.lt.s32.totalorder %s742_s18, 3 }
   0x4   : > { %p217_p2 = pnand %p641_p0, %p216_p1 }
   0x5   : > { %v348_v0 = vlaneseq (!%p217_p2)  ;;  %p259_p3 = scmp.lt.s32.totalorder (!%p217_p2), %s784_s19, 1  ;;  %s744_s21 = smov (!%p217_p2), 112   ;;  %vm299_vm0 = vcmask (!%p217_p2), 1042432  }
   0x6   : > { %220 = sbr.rel (%p217_p2) target bundleno = 371 (0x173), region = 36  ;;  %s745_s22 = smov (!%p217_p2), 127  }
   0x7   : > { %v789_v1 = vand.u32 (!%p217_p2), 127, %v348_v0  ;;  %p702_p4 = scmp.eq.s32.totalorder (!%p217_p2), %s784_s19, 0  ;;  %s746_s14 = smov (!%p217_p2), 0.0  }
   0x8   : > { %p703_p5 = scmp.eq.s32.totalorder (!%p217_p2), %s784_s19, 1  ;;  %s536_s12 = sshll.u32 (!%p217_p2), %s896_s5, 4  ;;  %s537_s12 = int_to_ptr.vmem [resolvable:$true] %s536_s12 }
   0x9   : > { %374 = vrot.lane.b32.xlu1 (!%p217_p2), %v789_v1, %s744_s21  ;;  %361 = vrot.lane.b32.xlu0 (!%p217_p2), %v789_v1, %s745_s22  ;;  %v795_v2 = vadd.s32 (!%p217_p2), 128, %v789_v1  ;;  %vm371_vm1 = vcmp.lt.s32.totalorder (!%p217_p2), %v789_v1, 112  ;;  %vm358_vm2 = vcmp.lt.s32.totalorder (!%p217_p2), %v789_v1, 127  ;;  %p725_p9 = scmp.lt.s32.totalorder (!%p217_p2), %s537_s12, %s537_s12 }
   0xd   : > { %s260_s20 = scalar_select %p259_p3, %s784_s19, 1  ;;  %376 = vrot.lane.b32.xlu1 %v795_v2, %s744_s21  ;;  %363 = vrot.lane.b32.xlu0 %v795_v2, %s745_s22 }
   0xe   : > { %688 = sst [smem:[#allocation2]] (%p702_p4), %s746_s14 }
   0xf   : > { %s672_s23 = sshll.u32 %s260_s20, 3  ;;  %689 = sst [smem:[#allocation2 + $0x1]] (%p702_p4), %s746_s14 }
  0x10   : > { %s263_s26 = scalar_lea.vmem %s891_s0, %s672_s23  ;;  %s268_s29 = scalar_lea.vmem %s892_s1, %s672_s23 }
  0x11   : > { %s273_s7 = scalar_lea.vmem %s893_s2, %s672_s23  ;;  %v284_v3 = vld [vmem:[%s263_s26] sm:$0x77]  ;;  %s283_s10 = scalar_lea.vmem %s895_s4, %s672_s23 }
  0x12   : > { %v285_v4 = vld [vmem:[%s268_s29] sm:$0x77]  ;;  %v289_v7 = vsub.f32 1.0, %v284_v3  ;;  %s278_s13 = scalar_lea.vmem %s894_s3, %s672_s23  ;;  %690 = sst [smem:[#allocation2 + $0x2]] (%p702_p4), %s746_s14 }
  0x13   : > { %v286_v5 = vld [vmem:[%s273_s7] sm:$0x77]  ;;  %v288_v6 = vmul.f32 %v285_v4, %v284_v3  ;;  %691 = sst [smem:[#allocation2 + $0x3]] (%p702_p4), %s746_s14  ;;  %s482_s15 = sld [smem:[#allocation2]] }
  0x14   : > { %v290_v8 = vmul.f32 %v289_v7, %v286_v5  ;;  %v287_v11 = vld [vmem:[%s278_s13] sm:$0x77]  ;;  %v312_v14 = vmul.f32 %v286_v5, %v284_v3  ;;  %692 = sst [smem:[#allocation2 + $0x4]] (%p702_p4), %s746_s14  ;;  %s659_s17 = sld [smem:[#allocation2 + $0x1]] }
  0x15   : > { %v293_v12 = vmul.f32 %v289_v7, %v287_v11  ;;  %v313_v15 = vmul.f32 %v287_v11, %v284_v3  ;;  %v331_v17 = vsub.f32 %v286_v5, %v287_v11  ;;  %s661_s29 = sld [smem:[#allocation2 + $0x3]]  ;;  %s662_s30 = sld [smem:[#allocation2 + $0x4]] }
  0x16   : > { %v811_v9 = vadd.f32 %v290_v8, %v288_v6 }
  0x17   : > { %v294_v13 = vsub.f32 %v290_v8, %v293_v12  ;;  %v314_v18 = vsub.f32 %v312_v14, %v313_v15  ;;  %v332_v20 = vand.u32 2147483647, %v331_v17 }
  0x18   : > { %354 = vrot.lane.b32.xlu0 %v811_v9, %s745_s22  ;;  %292 = vst [vmem:[%s283_s10] sm:$0x77] %v811_v9  ;;  %v817_v10 = vcombine.high %v811_v9, %v811_v9 }
  0x19   : > { %v295_v16 = vand.u32 2147483647, %v294_v13  ;;  %v315_v21 = vand.u32 2147483647, %v314_v18  ;;  %v334_v24 = vcombine.high %v332_v20, %v332_v20  ;;  %v336_v27 = vsel %vm299_vm0, %v332_v20, 0.0 }
  0x1a   : > { %356 = vrot.lane.b32.xlu1 %v817_v10, %s745_s22 }
  0x1b   : > { %v297_v19 = vcombine.high %v295_v16, %v295_v16  ;;  %v300_v22 = vsel %vm299_vm0, %v295_v16, 0.0  ;;  %v317_v26 = vcombine.high %v315_v21, %v315_v21  ;;  %v337_v28 = vsel %vm299_vm0, %v334_v24, 0.0 }
  0x1c   : > { %367 = vrot.lane.b32.xlu0 %v811_v9, %s744_s21  ;;  %v338_v29 = vadd.f32 %v337_v28, %v336_v27  ;;  %v319_v30 = vsel %vm299_vm0, %v315_v21, 0.0 }
  0x1d   : > { %v301_v23 = vsel %vm299_vm0, %v297_v19, 0.0  ;;  %v320_v31 = vsel %vm299_vm0, %v317_v26, 0.0 }
  0x1e   : > { %369 = vrot.lane.b32.xlu1 %v817_v10, %s744_s21  ;;  %v302_v25 = vadd.f32 %v301_v23, %v300_v22  ;;  %v321_v32 = vadd.f32 %v320_v31, %v319_v30  ;;  %s660_s21 = sld [smem:[#allocation2 + $0x2]] }
  0x3b   : > { %303 = vadd.xlane.f32.xlu0 %v302_v25 }
  0x3f   : > { %339 = vadd.xlane.f32.xlu0 %v338_v29 }
  0x42   : > { %322 = vadd.xlane.f32.xlu1 %v321_v32 }
  0x7b   : > { %v375_v33 = vpop.permute.xlu1 %374  ;;  %v362_v34 = vpop.permute.xlu0 %361 }
  0x7f   : > { %v377_v35 = vpop.permute.xlu1 %376  ;;  %v364_v36 = vpop.permute.xlu0 %363 }
  0x80   : > { %v378_v37 = vsel %vm371_vm1, %v375_v33, %v377_v35  ;;  %v379_v38 = vsel %vm371_vm1, %v377_v35, %v375_v33  ;;  %v365_v39 = vsel %vm358_vm2, %v362_v34, %v364_v36  ;;  %v366_v40 = vsel %vm358_vm2, %v364_v36, %v362_v34 }
  0x81   : > { %v422_v41 = vsub.s32 %v378_v37, %v789_v1  ;;  %v423_v42 = vsub.s32 %v379_v38, %v795_v2  ;;  %vm390_vm3 = vcmp.lt.s32.totalorder %v789_v1, %v365_v39  ;;  %vm392_vm4 = vcmp.lt.s32.totalorder %v795_v2, %v366_v40 }
  0x82   : > { %v380_v44 = vsub.s32 %v365_v39, %v789_v1  ;;  %v381_v45 = vsub.s32 %v366_v40, %v795_v2  ;;  %v391_v46 = vsel %vm390_vm3, %v789_v1, %v365_v39  ;;  %v393_v47 = vsel %vm392_vm4, %v795_v2, %v366_v40 }
  0x83   : > { %v425_v43 = vsub.s32 0, %v422_v41  ;;  %v428_v48 = vsub.s32 0, %v423_v42  ;;  %v395_v49 = vsub.s32 0, %v391_v46  ;;  %v402_v51 = vsub.s32 0, %v393_v47 }
  0x84   : > { %v383_v53 = vsub.s32 0, %v380_v44  ;;  %v386_v54 = vsub.s32 0, %v381_v45  ;;  %vm394_vm5 = vcmp.lt.s32.totalorder %v391_v46, 0  ;;  %vm401_vm6 = vcmp.lt.s32.totalorder %v393_v47, 0 }
  0x85   : > { %v656_v52 = vmin.u32 %v425_v43, %v422_v41  ;;  %v654_v55 = vmin.u32 %v395_v49, %v391_v46  ;;  %v655_v57 = vmin.u32 %v402_v51, %v393_v47  ;;  %v657_v58 = vmin.u32 %v428_v48, %v423_v42 }
  0x86   : > { %v652_v3 = vmin.u32 %v383_v53, %v380_v44  ;;  %v653_v4 = vmin.u32 %v386_v54, %v381_v45 }
  0x87   : > { %v398_v59 = vand.u32 15, %v654_v55  ;;  %v405_v62 = vand.u32 15, %v655_v57  ;;  %vm430_vm7 = vcmp.eq.s32.totalorder %v656_v52, 16  ;;  %vm431_vm13 = vcmp.eq.s32.totalorder %v657_v58, 16 }
  0x88   : > { %vm388_vm14 = vcmp.eq.s32.totalorder %v652_v3, 1 }
  0x89   : > { %v399_v0 = vsub.s32 0, %v398_v59  ;;  %v406_v5 = vsub.s32 0, %v405_v62 }
  0x8a   : > { %v355_v50 = vpop.permute.xlu0 %354 }
  0x8b   : > { %v400_v11 = vsel %vm394_vm5, %v399_v0, %v398_v59  ;;  %v407_v15 = vsel %vm401_vm6, %v406_v5, %v405_v62 }
  0x8c   : > { %v357_v56 = vpop.permute.xlu1 %356  ;;  %vm408_vm8 = vcmp.ne.s32.totalorder %v400_v11, 0  ;;  %vm410_vm9 = vcmp.lt.s32.totalorder %v400_v11, 0  ;;  %v414_v16 = vadd.s32 16, %v400_v11  ;;  %vm409_vm10 = vcmp.ne.s32.totalorder %v407_v15, 0 }
  0x8d   : > { %v359_v60 = vsel %vm358_vm2, %v355_v50, %v357_v56  ;;  %v360_v63 = vsel %vm358_vm2, %v357_v56, %v355_v50  ;;  %vm411_vm11 = vcmp.lt.s32.totalorder %v407_v15, 0  ;;  %vm412_vm12 = vmand %vm410_vm9, %vm408_vm8  ;;  %v415_v1 = vadd.s32 16, %v407_v15 }
  0x8e   : > { %v368_v61 = vpop.permute.xlu0 %367  ;;  %v432_v6 = vsub.f32 %v359_v60, %v811_v9  ;;  %v433_v12 = vsub.f32 %v360_v63, %v817_v10  ;;  %vm413_vm15 = vmand %vm411_vm11, %vm409_vm10  ;;  %v416_v19 = vsel %vm412_vm12, %v414_v16, %v400_v11  ;;  %vm389_vm2 = vcmp.eq.s32.totalorder %v653_v4, 1 }
  0x8f   : > { %v417_v23 = vsel %vm413_vm15, %v415_v1, %v407_v15 }
  0x90   : > { %v370_v2 = vpop.permute.xlu1 %369  ;;  %v434_v20 = vand.u32 2147483647, %v432_v6  ;;  %v435_v24 = vand.u32 2147483647, %v433_v12  ;;  %vm419_vm4 = vcmp.ne.s32.totalorder %v417_v23, 15 }
  0x91   : > { %v372_v7 = vsel %vm371_vm1, %v368_v61, %v370_v2  ;;  %v373_v8 = vsel %vm371_vm1, %v370_v2, %v368_v61  ;;  %vm418_vm1 = vcmp.ne.s32.totalorder %v416_v19, 15  ;;  %vm421_vm5 = vmand %vm389_vm2, %vm419_vm4 }
  0x92   : > { %v450_v13 = vsub.f32 %v372_v7, %v811_v9  ;;  %v451_v14 = vsub.f32 %v373_v8, %v817_v10  ;;  %vm420_vm3 = vmand %vm388_vm14, %vm418_vm1  ;;  %v437_v28 = vsel %vm421_vm5, %v435_v24, 0.0 }
  0x93   : > { %v436_v26 = vsel %vm420_vm3, %v434_v20, 0.0  ;;  %v439_v29 = vsel %vm299_vm0, %v437_v28, 0.0 }
  0x94   : > { %v452_v17 = vand.u32 2147483647, %v450_v13  ;;  %v453_v18 = vand.u32 2147483647, %v451_v14  ;;  %v438_v27 = vsel %vm299_vm0, %v436_v26, 0.0 }
  0x95   : > { %v440_v30 = vadd.f32 %v439_v29, %v438_v27 }
  0x96   : > { %v454_v9 = vsel %vm430_vm7, %v452_v17, 0.0  ;;  %v455_v21 = vsel %vm431_vm13, %v453_v18, 0.0 }
  0x97   : > { %v456_v10 = vsel %vm299_vm0, %v454_v9, 0.0  ;;  %v457_v22 = vsel %vm299_vm0, %v455_v21, 0.0  ;;  %441 = vadd.xlane.f32.xlu0 %v440_v30 }
  0x98   : > { %v458_v25 = vadd.f32 %v457_v22, %v456_v10 }
  0x9a   : > { %459 = vadd.xlane.f32.xlu1 %v458_v25 }
  0xc8   : > { %v304_v31 = vpop.xlane.xlu0 %303 }
  0xc9   : > { %v305_v32 = vrot.slane %v304_v31, 4 }
  0xcb   : > { %v306_v33 = vadd.f32 %v305_v32, %v304_v31 }
  0xcc   : > { %v340_v34 = vpop.xlane.xlu0 %339 }
  0xcd   : > { %v307_v35 = vrot.slane %v306_v33, 2  ;;  %v341_v36 = vrot.slane %v340_v34, 4 }
  0xcf   : > { %v342_v37 = vadd.f32 %v341_v36, %v340_v34  ;;  %v323_v38 = vpop.xlane.xlu1 %322  ;;  %v308_v39 = vadd.f32 %v307_v35, %v306_v33 }
  0xd0   : > { %v324_v40 = vrot.slane %v323_v38, 4 }
  0xd1   : > { %v343_v41 = vrot.slane %v342_v37, 2  ;;  %v309_v42 = vrot.slane %v308_v39, 1 }
  0xd2   : > { %v325_v43 = vadd.f32 %v324_v40, %v323_v38 }
  0xd3   : > { %v310_v44 = vadd.f32 %v309_v42, %v308_v39  ;;  %v344_v45 = vadd.f32 %v343_v41, %v342_v37 }
  0xd4   : > { %v326_v46 = vrot.slane %v325_v43, 2 }
  0xd5   : > { %677 = vpush %v310_v44  ;;  %v345_v47 = vrot.slane %v344_v45, 1 }
  0xd6   : > { %v327_v48 = vadd.f32 %v326_v46, %v325_v43 }
  0xd7   : > { %v346_v50 = vadd.f32 %v345_v47, %v344_v45 }
  0xd8   : > { %v328_v49 = vrot.slane %v327_v48, 1 }
  0xda   : > { %v329_v51 = vadd.f32 %v328_v49, %v327_v48 }
  0xdc   : > { %679 = vpush %v329_v51 }
  0xdd   : > { %681 = vpush %v346_v50 }
 0x106   : > { %s678_s16 = spop %677 }
 0x107   : > { %s483_s20 = sadd.f32 %s678_s16, %s482_s15  ;;  %s718_s16 = scalar_lea.vmem %s537_s12, 16 }
 0x108   : > { %p719_p6 = scmp.ne.s32.totalorder %s537_s12, %s718_s16  ;;  %p726_p10 = scmp.lt.s32.totalorder %s718_s16, %s718_s16 }
 0x109   : > { %485 = sst [smem:[#allocation2]] %s483_s20  ;;  %s507_s22 = smul.f32 0.0006510417, %s483_s20 }
 0x10a   : > { %p720_p7 = pnand %p719_p6, %p703_p5  ;;  %p727_p11 = por %p726_p10, %p725_p9 }
 0x10b   : > { %694 = sst [smem:[#allocation2]] (%p703_p5), %s507_s22 }
 0x10c   : > { %p721_p8 = pneg %p720_p7 }
 0x10d   : > { %s680_s23 = spop %679 }
 0x10e   : > { %s487_s24 = sadd.f32 %s680_s23, %s659_s17  ;;  %s682_s25 = spop %681 }
 0x10f   : > { %s491_s26 = sadd.f32 %s682_s25, %s660_s21  ;;  %p728_p12 = pnand %p727_p11, %p721_p8 }
 0x110   : > { %489 = sst [smem:[#allocation2 + $0x1]] %s487_s24  ;;  %s510_s27 = smul.f32 0.0006510417, %s487_s24 }
 0x111   : > { %493 = sst [smem:[#allocation2 + $0x2]] %s491_s26  ;;  %s513_s28 = smul.f32 0.0006510417, %s491_s26 }
 0x112   : > { %695 = sst [smem:[#allocation2 + $0x1]] (%p703_p5), %s510_s27 }
 0x113   : > { %696 = sst [smem:[#allocation2 + $0x2]] (%p703_p5), %s513_s28 }
 0x124   : > { %v442_v55 = vpop.xlane.xlu0 %441 }
 0x125   : > { %v443_v57 = vrot.slane %v442_v55, 4 }
 0x127   : > { %v460_v52 = vpop.xlane.xlu1 %459  ;;  %v444_v59 = vadd.f32 %v443_v57, %v442_v55 }
 0x128   : > { %v461_v53 = vrot.slane %v460_v52, 4 }
 0x129   : > { %v445_v60 = vrot.slane %v444_v59, 2 }
 0x12a   : > { %v462_v54 = vadd.f32 %v461_v53, %v460_v52 }
 0x12b   : > { %v446_v62 = vadd.f32 %v445_v60, %v444_v59 }
 0x12c   : > { %v463_v56 = vrot.slane %v462_v54, 2 }
 0x12d   : > { %v447_v63 = vrot.slane %v446_v62, 1 }
 0x12e   : > { %v464_v58 = vadd.f32 %v463_v56, %v462_v54 }
 0x12f   : > { %v448_v2 = vadd.f32 %v447_v63, %v446_v62 }
 0x130   : > { %v465_v61 = vrot.slane %v464_v58, 1 }
 0x131   : > { %683 = vpush %v448_v2 }
 0x132   : > { %v466_v0 = vadd.f32 %v465_v61, %v464_v58 }
 0x134   : > { %685 = vpush %v466_v0 }
 0x162   : > { %s684_s6 = spop %683 }
 0x163   : > { %s495_s7 = sadd.f32 %s684_s6, %s661_s29 }
 0x165   : > { %s686_s8 = spop %685  ;;  %497 = sst [smem:[#allocation2 + $0x3]] %s495_s7 }
 0x166   : > { %s499_s9 = sadd.f32 %s686_s8, %s662_s30  ;;  %s516_s13 = smul.f32 0.00069444446, %s495_s7 }
 0x168   : > { %501 = sst [smem:[#allocation2 + $0x4]] %s499_s9  ;;  %s518_s14 = smul.f32 0.00069444446, %s499_s9 }
 0x16a   : > { %s519_s15 = sadd.f32 %s518_s14, %s516_s13 }
 0x16c   : > { %697 = sst [smem:[#allocation2 + $0x3]] (%p703_p5), %s519_s15 }
 0x16d   : > { %731 = shalt.err (!%p728_p12)
}
 0x16e   : > { %s747_s17 = smov [#allocation2]  }
 0x16f   : > { %699 = dma.smem_to_vmem (%p703_p5), %s747_s17, 16, %s537_s12, [#allocation3]  }
 0x170   : > { %737 = dma.done.wait (%p703_p5), [#allocation3], 16  }
 0x171   : > { %739 = vsyncadd (%p703_p5), [#allocation3], 4294967280 }
 0x172   : > { %544 = sfence }
 0x173 PF: > { %s17_s18 = sadd.s32 1, %s742_s18  }
 0x174   : > { %p14_p13 = scmp.ge.s32.totalorder %s17_s18, 4  }
 0x176   :  { %16 = sbr.rel (!%p14_p13) target bundleno = 1 (0x1), region = 102 }
 0x17d   :  { %558 = vsyncpa [#allocation3], 1 }
 0x17e   :  { %560 = vsyncpa [#allocation3 + $0x1], 1 }

// kernel: inpainting_loss.13
= control target key start
LH: loop header
LB: loop body
LE: loop exit
PB: predicated region body
PF: predicated region fallthrough
CT: control target
= control target key end

     0   :  { %8 = vsyncpa [#allocation3], 0  ;;  %s683_s12 = smov 0   ;;  %s726_s0 = inlined_call_operand.vmem [shape: f32[6,8,256], index: 0, kind: input, shape index: {}, may-alias: {0,1,2}]   ;;  %s727_s1 = inlined_call_operand.vmem [shape: f32[6,8,256], index: 1, kind: input, shape index: {}, may-alias: {0,1,2}]   ;;  %s728_s2 = inlined_call_operand.vmem [shape: f32[6,8,256], index: 2, kind: input, shape index: {}, may-alias: {0,1,2}]   ;;  %s729_s3 = inlined_call_operand.vmem [shape: f32[1,2], index: 3, kind: output, shape index: {}]  }
   0x1 LB: > { %s689_s13 = sadd.s32 4294967295, %s659_s12   ;;  %p585_p0 = scmp.ge.s32.totalorder %s659_s12, 1  ;;  %s659_s12 = sphi %s683_s12, %s14_s12  }
   0x2   : > { %p161_p1 = scmp.lt.s32.totalorder %s659_s12, 3 }
   0x4   : > { %p162_p2 = pnand %p585_p0, %p161_p1 }
   0x5   : > { %s197_s14 = sadd.s32 (!%p162_p2), 2, %s689_s13  ;;  %s204_s15 = sadd.s32 (!%p162_p2), 4, %s689_s13  ;;  %vm461_vm0 = vcmask (!%p162_p2), 64512  }
   0x6   : > { %165 = sbr.rel (%p162_p2) target bundleno = 465 (0x1d1), region = 32  ;;  %p198_p3 = scmp.lt.s32.totalorder (!%p162_p2), %s197_s14, 5 }
   0x7   : > { %p205_p4 = scmp.lt.s32.totalorder (!%p162_p2), %s204_s15, 5  ;;  %p192_p5 = scmp.lt.s32.totalorder (!%p162_p2), %s689_s13, 5 }
   0x8   : > { %p621_p6 = scmp.eq.s32.totalorder (!%p162_p2), %s689_s13, 0  ;;  %s661_s29 = smov (!%p162_p2), 0.0  }
   0x9   : > { %p622_p7 = scmp.eq.s32.totalorder (!%p162_p2), %s689_s13, 1  ;;  %s518_s17 = sshll.u32 (!%p162_p2), %s729_s3, 4  ;;  %s519_s17 = int_to_ptr.vmem [resolvable:$true] %s518_s17 }
   0xa   : > { %p642_p11 = scmp.lt.s32.totalorder (!%p162_p2), %s519_s17, %s519_s17 }
   0xd   : > { %s731_s14 = smov (!%p198_p3, %s197_s14), 5  ;;  %s733_s15 = smov (!%p205_p4, %s204_s15), 5 }
   0xe   : > { %s601_s16 = sshll.u32 %s731_s14, 4  ;;  %s602_s20 = sshll.u32 %s733_s15, 4 }
   0xf   : > { %s202_s19 = scalar_lea.vmem %s727_s1, %s601_s16  ;;  %s209_s23 = scalar_lea.vmem %s728_s2, %s602_s20 }
  0x10   : > { %v214_v0 = vld [vmem:[%s202_s19 + $0x8] sm:$0xff]  ;;  %v213_v1 = vld [vmem:[%s202_s19] sm:$0xff]  ;;  %s193_s24 = scalar_select %p192_p5, %s689_s13, 5 }
  0x11   : > { %246 = vmatprep.subr.mxu0 %v214_v0  ;;  %310 = vmatprep.mubr.f32.mxu0 %v214_v0  ;;  %v216_v2 = vld [vmem:[%s209_s23 + $0x8] sm:$0xff]  ;;  %v215_v3 = vld [vmem:[%s209_s23] sm:$0xff]  ;;  %612 = sst [smem:[#allocation2]] (%p621_p6), %s661_s29  ;;  %s635_s20 = scalar_lea.vmem %s519_s17, 16 }
  0x12   : > { %247 = vmatpush1.xpose.msra.mxu0 %v213_v1  ;;  %s600_s25 = sshll.u32 %s193_s24, 4  ;;  %v217_v6 = vsub.f32 %v213_v1, %v215_v3  ;;  %v218_v7 = vsub.f32 %v214_v0, %v216_v2  ;;  %613 = sst [smem:[#allocation2 + $0x1]] (%p621_p6), %s661_s29 }
  0x13   : > { %388 = vmatprep.subr.mxu0 %v216_v2  ;;  %s196_s28 = scalar_lea.vmem %s726_s0, %s600_s25  ;;  %s493_s30 = sld [smem:[#allocation2]] }
  0x14   : > { %v212_v4 = vld [vmem:[%s196_s28 + $0x8] sm:$0xff]  ;;  %v211_v5 = vld [vmem:[%s196_s28] sm:$0xff]  ;;  %v219_v8 = vand.u32 2147483647, %v217_v6  ;;  %v220_v9 = vand.u32 2147483647, %v218_v7  ;;  %p636_p8 = scmp.ne.s32.totalorder %s519_s17, %s635_s20  ;;  %p643_p12 = scmp.lt.s32.totalorder %s635_s20, %s635_s20 }
  0x15   : > { %311 = vmatmul.mubr.f32.vlgmr.msra.gmra.mrb[0].mxu0 %v213_v1  ;;  %317 = vmatprep.subr.mxu1 %v212_v4  ;;  %v231_v11 = vsub.f32 %v211_v5, %v215_v3  ;;  %v232_v12 = vsub.f32 %v212_v4, %v216_v2  ;;  %s593_s9 = sld [smem:[#allocation2 + $0x1]] }
  0x16   : > { %389 = vmatpush1.xpose.msra.mxu0 %v215_v3  ;;  %318 = vmatpush1.xpose.msra.mxu1 %v211_v5  ;;  %v221_v10 = vadd.f32 %v220_v9, %v219_v8  ;;  %p637_p9 = pnand %p636_p8, %p622_p7  ;;  %p644_p13 = por %p643_p12, %p642_p11 }
  0x17   : > { %452 = vmatprep.mubr.f32.mxu0 %v216_v2  ;;  %381 = vmatprep.mubr.f32.mxu1 %v212_v4  ;;  %v233_v13 = vand.u32 2147483647, %v231_v11  ;;  %v234_v14 = vand.u32 2147483647, %v232_v12 }
  0x18   : > { %222 = vadd.xlane.f32.xlu0 %v221_v10  ;;  %p638_p10 = pneg %p637_p9 }
  0x19   : > { %453 = vmatmul.mubr.f32.vlgmr.msra.gmra.mrb[2].mxu0 %v215_v3  ;;  %382 = vmatmul.mubr.f32.vlgmr.msra.gmra.mrb[0].mxu1 %v211_v5  ;;  %v235_v15 = vadd.f32 %v234_v14, %v233_v13 }
  0x1a   : > { %p645_p0 = pnand %p644_p13, %p638_p10 }
  0x1c   : > { %236 = vadd.xlane.f32.xlu0 %v235_v15 }
  0xa5   : > { %v223_v31 = vpop.xlane.xlu0 %222 }
  0xa6   : > { %v224_v32 = vrot.slane %v223_v31, 4 }
  0xa8   : > { %v225_v33 = vadd.f32 %v224_v32, %v223_v31 }
  0xa9   : > { %v237_v34 = vpop.xlane.xlu0 %236 }
  0xaa   : > { %v238_v35 = vrot.slane %v237_v34, 4  ;;  %v226_v36 = vrot.slane %v225_v33, 2 }
  0xac   : > { %v239_v37 = vadd.f32 %v238_v35, %v237_v34  ;;  %v227_v40 = vadd.f32 %v226_v36, %v225_v33 }
  0xae   : > { %v240_v38 = vrot.slane %v239_v37, 2  ;;  %v228_v41 = vrot.slane %v227_v40, 1 }
  0xb0   : > { %v241_v39 = vadd.f32 %v240_v38, %v239_v37  ;;  %v229_v43 = vadd.f32 %v228_v41, %v227_v40 }
  0xb2   : > { %v242_v42 = vrot.slane %v241_v39, 1  ;;  %603 = vpush %v229_v43 }
  0xb4   : > { %v243_v44 = vadd.f32 %v242_v42, %v241_v39 }
  0xb6   : > { %605 = vpush %v243_v44 }
  0xe3   : > { %s604_s4 = spop %603 }
  0xe7   : > { %s606_s5 = spop %605 }
  0xe8   : > { %v312_v16 = vpop.f32.mrb[0].mxu0  ;;  %s245_s6 = sadd.f32 %s606_s5, %s604_s4 }
  0xe9   : > { %v314_v17 = vpop.f32.mrb[1].mxu0  ;;  %v316_v19 = vmul.f32 0.00048828125, %v312_v16 }
  0xea   : > { %s494_s7 = sadd.f32 %s493_s30, %s245_s6 }
  0xec   : > { %v454_v18 = vpop.f32.mrb[2].mxu0  ;;  %v383_v21 = vpop.f32.mrb[0].mxu1  ;;  %496 = sst [smem:[#allocation2]] %s494_s7  ;;  %s506_s8 = smul.f32 0.00024414063, %s494_s7 }
  0xed   : > { %v458_v20 = vmul.f32 0.00048828125, %v454_v18  ;;  %v456_v22 = vpop.f32.mrb[3].mxu0  ;;  %v387_v23 = vmul.f32 0.00048828125, %v383_v21  ;;  %v385_v24 = vpop.f32.mrb[1].mxu1 }
  0xee   : > { %615 = sst [smem:[#allocation2]] (%p622_p7), %s506_s8 }
  0xef   : > { %v459_v25 = vsub.f32 %v316_v19, %v458_v20  ;;  %v472_v26 = vsub.f32 %v387_v23, %v458_v20 }
  0xf1   : > { %v460_v27 = vand.u32 2147483647, %v459_v25  ;;  %v473_v29 = vand.u32 2147483647, %v472_v26 }
  0xf3   : > { %v462_v28 = vsel %vm461_vm0, %v460_v27, 0.0  ;;  %v474_v30 = vsel %vm461_vm0, %v473_v29, 0.0 }
  0xf4   : > { %463 = vadd.xlane.f32.xlu1 %v462_v28 }
  0xf8   : > { %475 = vadd.xlane.f32.xlu1 %v474_v30 }
 0x181   : > { %v464_v45 = vpop.xlane.xlu1 %463 }
 0x182   : > { %v465_v46 = vrot.slane %v464_v45, 4 }
 0x184   : > { %v466_v47 = vadd.f32 %v465_v46, %v464_v45 }
 0x185   : > { %v476_v48 = vpop.xlane.xlu1 %475 }
 0x186   : > { %v467_v49 = vrot.slane %v466_v47, 2  ;;  %v477_v50 = vrot.slane %v476_v48, 4 }
 0x188   : > { %v478_v51 = vadd.f32 %v477_v50, %v476_v48  ;;  %v468_v52 = vadd.f32 %v467_v49, %v466_v47 }
 0x18a   : > { %v479_v53 = vrot.slane %v478_v51, 2  ;;  %v469_v54 = vrot.slane %v468_v52, 1 }
 0x18c   : > { %v480_v55 = vadd.f32 %v479_v53, %v478_v51  ;;  %v470_v56 = vadd.f32 %v469_v54, %v468_v52 }
 0x18e   : > { %607 = vpush %v470_v56  ;;  %v481_v57 = vrot.slane %v480_v55, 1 }
 0x190   : > { %v482_v58 = vadd.f32 %v481_v57, %v480_v55 }
 0x192   : > { %609 = vpush %v482_v58 }
 0x1bf   : > { %s608_s10 = spop %607 }
 0x1c3   : > { %s610_s11 = spop %609 }
 0x1c4   : > { %s484_s14 = sadd.f32 %s610_s11, %s608_s10 }
 0x1c6   : > { %s498_s18 = sadd.f32 %s593_s9, %s484_s14 }
 0x1c8   : > { %500 = sst [smem:[#allocation2 + $0x1]] %s498_s18  ;;  %s509_s19 = smul.f32 0.0078125, %s498_s18 }
 0x1ca   : > { %616 = sst [smem:[#allocation2 + $0x1]] (%p622_p7), %s509_s19 }
 0x1cb   : > { %648 = shalt.err (!%p645_p0)
}
 0x1cc   : > { %s662_s21 = smov [#allocation2]  }
 0x1cd   : > { %618 = dma.smem_to_vmem (%p622_p7), %s662_s21, 16, %s519_s17, [#allocation3]  }
 0x1ce   : > { %654 = dma.done.wait (%p622_p7), [#allocation3], 16  }
 0x1cf   : > { %656 = vsyncadd (%p622_p7), [#allocation3], 4294967280 }
 0x1d0   : > { %526 = sfence }
 0x1d1 PF: > { %s14_s12 = sadd.s32 1, %s659_s12  }
 0x1d2   : > { %p11_p1 = scmp.ge.s32.totalorder %s14_s12, 4  }
 0x1d4   :  { %13 = sbr.rel (!%p11_p1) target bundleno = 1 (0x1), region = 77 }
 0x1db   :  { %532 = vsyncpa [#allocation3], 1 }
 0x1dc   :  { %534 = vsyncpa [#allocation3 + $0x1], 1 }

// kernel: inpainting_loss.11
= control target key start
LH: loop header
LB: loop body
LE: loop exit
PB: predicated region body
PF: predicated region fallthrough
CT: control target
= control target key end

     0   :  { %s637_s18 = smov 0   ;;  %s699_s0 = inlined_call_operand.vmem [shape: f32[6,8,64], index: 0, kind: input, shape index: {}]   ;;  %s700_s1 = inlined_call_operand.vmem [shape: f32[16,8], index: 1, kind: input, shape index: {}]   ;;  %s701_s2 = inlined_call_operand.vmem [shape: f32[16,1], index: 2, kind: input, shape index: {}]   ;;  %s702_s3 = inlined_call_operand.vmem [shape: f32[64,16], index: 3, kind: input, shape index: {}]   ;;  %s703_s4 = inlined_call_operand.vmem [shape: f32[6,16,64], index: 4, kind: output, shape index: {0}]   ;;  %s704_s5 = inlined_call_operand.vmem [shape: f32[6,16,16], index: 5, kind: output, shape index: {1}]  }
   0x1 LB: > { %s517_s19 = sadd.s32 4294967295, %s604_s18   ;;  %p521_p0 = scmp.ge.s32.totalorder %s604_s18, 1  ;;  %s604_s18 = sphi %s637_s18, %s16_s18  }
   0x2   : > { %p189_p1 = scmp.lt.s32.totalorder %s604_s18, 7 }
   0x4   : > { %p190_p2 = pnand %p521_p0, %p189_p1 }
   0x5   : > { %p221_p3 = scmp.lt.s32.totalorder (!%p190_p2), %s517_s19, 5  ;;  %v236_v0 = vld [vmem:[%s700_s1] sm:$0xff] (!%p190_p2)  ;;  %vm250_vm0 = vcmask (!%p190_p2), 64512   ;;  %v606_v2 = vmov (!%p190_p2), 0   ;;  %v338_v4 = vld [vmem:[%s702_s3 + $0x8] sm:$0xff] (!%p190_p2)  ;;  %v339_v6 = vld [vmem:[%s702_s3 + $0x10] sm:$0xff] (!%p190_p2) }
   0x6   : > { %193 = sbr.rel (%p190_p2) target bundleno = 451 (0x1c3), region = 36  ;;  %v238_v1 = vld [vmem:[%s701_s2] sm:$0xff] (!%p190_p2)  ;;  %550 = vmatprep.mubr.msk.f32.mxu0 (!%p190_p2), %vm250_vm0, %v236_v0  ;;  %597 = vset.pattern.permute.xlu0 (!%p190_p2), %v606_v2  ;;  %v340_v7 = vld [vmem:[%s702_s3 + $0x18] sm:$0xff] (!%p190_p2)  ;;  %v239_v8 = vld [vmem:[%s701_s2 + $0x8] sm:$0xff] (!%p190_p2)  ;;  %vm334_vm1 = vcmask (!%p190_p2), 523264   ;;  %vm426_vm2 = vcmask (!%p190_p2), 130048  }
   0x7   : > { %v337_v3 = vld [vmem:[%s702_s3] sm:$0xff] (!%p190_p2)  ;;  %242 = vperm.xlu0 (!%p190_p2), %597, %v238_v1   ;;  %v576_v9 = vpack.c.bf16 (!%p190_p2), %v340_v7, %v339_v6  ;;  %v342_v11 = vld [vmem:[%s702_s3 + $0x28] sm:$0xff] (!%p190_p2)  ;;  %v343_v15 = vld [vmem:[%s702_s3 + $0x30] sm:$0xff] (!%p190_p2) }
   0x8   : > { %v572_v5 = vpack.c.bf16 (!%p190_p2), %v338_v4, %v337_v3  ;;  %v341_v10 = vld [vmem:[%s702_s3 + $0x20] sm:$0xff] (!%p190_p2)  ;;  %v237_v13 = vld [vmem:[%s700_s1 + $0x8] sm:$0xff] (!%p190_p2)  ;;  %v344_v16 = vld [vmem:[%s702_s3 + $0x38] sm:$0xff] (!%p190_p2) }
   0x9   : > { %v580_v14 = vpack.c.bf16 (!%p190_p2), %v342_v11, %v341_v10  ;;  %v584_v17 = vpack.c.bf16 (!%p190_p2), %v344_v16, %v343_v15 }
   0xa   : > { %573 = vmatprep.subr.bf16.mxu1 (!%p190_p2), %v572_v5 }
   0xb   : > { %575 = vmatpush3.bf16.msra.mxu1 (!%p190_p2), %v572_v5  ;;  %247 = vperm.xlu0 (!%p190_p2), %597, %v239_v8  }
   0xc   : > { %577 = vmatprep.subr.bf16.mxu1 (!%p190_p2), %v576_v9 }
   0xd   : > { %s706_s19 = smov (!%p221_p3, %s517_s19), 5 }
   0xe   : > { %s522_s9 = sshll.u32 %s706_s19, 3  ;;  %s533_s25 = sshll.u32 %s706_s19, 4 }
   0xf   : > { %s224_s12 = scalar_lea.vmem %s699_s0, %s522_s9  ;;  %579 = vmatpush3.bf16.msra.mxu1 %v576_v9  ;;  %s229_s28 = scalar_lea.vmem %s703_s4, %s533_s25 }
  0x10   : > { %v235_v12 = vld [vmem:[%s224_s12] sm:$0xff]  ;;  %581 = vmatprep.subr.bf16.mxu1 %v580_v14  ;;  %s234_s19 = scalar_lea.vmem %s704_s5, %s533_s25 }
  0x11   : > { %548 = vmatprep.subr.mxu0 %v235_v12 }
  0x12   : > { %549 = vmatpush3.msra.mxu0 %v235_v12 }
  0x13   : > { %551 = vmatmul.mubr.msk.f32.vlgmr.msra.gmra.mrb[0].mxu0 %vm250_vm0, %v237_v13  ;;  %583 = vmatpush3.bf16.msra.mxu1 %v580_v14 }
  0x14   : > { %585 = vmatprep.subr.bf16.mxu1 %v584_v17 }
  0x17   : > { %587 = vmatpush3.bf16.msra.mxu1 %v584_v17 }
  0x86   : > { %v243_v18 = vpop.permute.xlu0 %242 }
  0x8a   : > { %v248_v19 = vpop.permute.xlu0 %247 }
  0xe6   : > { %v552_v20 = vpop.f32.mrb[0].mxu0 }
  0xe7   : > { %v329_v21 = vadd.f32 %v552_v20, %v248_v19  ;;  %v323_v22 = vpop.f32.mrb[1].mxu0 }
  0xe8   : > { %v324_v23 = vadd.f32 %v323_v22, %v243_v18 }
  0xe9   : > { %v333_v24 = vmax.f32 %v329_v21, 0.0 }
  0xea   : > { %v332_v25 = vmax.f32 %v324_v23, 0.0 }
  0xeb   : > { %336 = vst.msk [vmem:[%s229_s28 + $0x8] sm:$0xff] %vm334_vm1, %v333_v24 }
  0xec   : > { %569 = vmatprep.mubr.msk.f32.mxu1 %vm334_vm1, %v332_v25  ;;  %335 = vst.msk [vmem:[%s229_s28] sm:$0xff] %vm334_vm1, %v332_v25 }
  0xed   : > { %570 = vmatmul.mubr.msk.f32.vlgmr.msra.gmra.mrb[0].mxu1 %vm334_vm1, %v333_v24 }
 0x1c0   : > { %v571_v26 = vpop.f32.mrb[0].mxu1 }
 0x1c1   : > { %428 = vst.msk [vmem:[%s234_s19 + $0x8] sm:$0xff] %vm426_vm2, %v571_v26  ;;  %v417_v27 = vpop.f32.mrb[1].mxu1 }
 0x1c2   : > { %427 = vst.msk [vmem:[%s234_s19] sm:$0xff] %vm426_vm2, %v417_v27 }
 0x1c3 PF: > { %s16_s18 = sadd.s32 1, %s604_s18  }
 0x1c4   : > { %p13_p4 = scmp.ge.s32.totalorder %s16_s18, 8  }
 0x1c6   :  { %15 = sbr.rel (!%p13_p4) target bundleno = 1 (0x1), region = 78 }

// kernel: inpainting_loss.14
= control target key start
LH: loop header
LB: loop body
LE: loop exit
PB: predicated region body
PF: predicated region fallthrough
CT: control target
= control target key end

     0   :  { %8 = vsyncpa [#allocation3], 0  ;;  %s795_s12 = smov 0   ;;  %s866_s0 = inlined_call_operand.vmem [shape: f32[6,16,64], index: 0, kind: input, shape index: {}, may-alias: {0,1,2}]   ;;  %s867_s1 = inlined_call_operand.vmem [shape: f32[6,16,64], index: 1, kind: input, shape index: {}, may-alias: {0,1,2}]   ;;  %s868_s2 = inlined_call_operand.vmem [shape: f32[6,16,64], index: 2, kind: input, shape index: {}, may-alias: {0,1,2}]   ;;  %s869_s3 = inlined_call_operand.vmem [shape: f32[1,2], index: 3, kind: output, shape index: {}]  }
   0x1 LB: > { %s801_s13 = sadd.s32 4294967295, %s771_s12   ;;  %p634_p0 = scmp.ge.s32.totalorder %s771_s12, 1  ;;  %s771_s12 = sphi %s795_s12, %s14_s12  }
   0x2   : > { %p161_p1 = scmp.lt.s32.totalorder %s771_s12, 3 }
   0x4   : > { %p162_p2 = pnand %p634_p0, %p161_p1 }
   0x5   : > { %s197_s14 = sadd.s32 (!%p162_p2), 2, %s801_s13  ;;  %p192_p3 = scmp.lt.s32.totalorder (!%p162_p2), %s801_s13, 5  ;;  %vm221_vm0 = vcmask (!%p162_p2), 523264   ;;  %vm504_vm2 = vcmask (!%p162_p2), 130048  }
   0x6   : > { %165 = sbr.rel (%p162_p2) target bundleno = 480 (0x1e0), region = 32  ;;  %p198_p4 = scmp.lt.s32.totalorder (!%p162_p2), %s197_s14, 5  ;;  %vm817_vm1 = vmpackc.low (!%p162_p2), %vm221_vm0, %vm221_vm0 }
   0x7   : > { %s204_s15 = sadd.s32 (!%p162_p2), 4, %s801_s13  ;;  %p733_p6 = scmp.eq.s32.totalorder (!%p162_p2), %s801_s13, 0 }
   0x8   : > { %p205_p5 = scmp.lt.s32.totalorder (!%p162_p2), %s204_s15, 5  ;;  %s773_s29 = smov (!%p162_p2), 0.0  }
   0x9   : > { %p734_p7 = scmp.eq.s32.totalorder (!%p162_p2), %s801_s13, 1 }
   0xd   : > { %s193_s16 = scalar_select %p192_p3, %s801_s13, 5 }
   0xe   : > { %s873_s14 = smov (!%p198_p4, %s197_s14), 5  ;;  %s875_s15 = smov (!%p205_p5, %s204_s15), 5 }
   0xf   : > { %s661_s17 = sshll.u32 %s193_s16, 4  ;;  %s662_s18 = sshll.u32 %s873_s14, 4 }
  0x10   : > { %s196_s21 = scalar_lea.vmem %s866_s0, %s661_s17  ;;  %s202_s24 = scalar_lea.vmem %s867_s1, %s662_s18 }
  0x11   : > { %v211_v0 = vld [vmem:[%s196_s21] sm:$0xff]  ;;  %v212_v1 = vld [vmem:[%s196_s21 + $0x8] sm:$0xff]  ;;  %s663_s25 = sshll.u32 %s875_s15, 4  ;;  %724 = sst [smem:[#allocation2]] (%p733_p6), %s773_s29 }
  0x12   : > { %v213_v2 = vld [vmem:[%s202_s24] sm:$0xff]  ;;  %v214_v3 = vld [vmem:[%s202_s24 + $0x8] sm:$0xff]  ;;  %v703_v5 = vpack.c.bf16 %v212_v1, %v211_v0  ;;  %687 = vmatprep.mubr.msk.f32.mxu1 %vm221_vm0, %v211_v0  ;;  %s209_s28 = scalar_lea.vmem %s868_s2, %s663_s25  ;;  %725 = sst [smem:[#allocation2 + $0x1]] (%p733_p6), %s773_s29 }
  0x13   : > { %v697_v6 = vpack.c.bf16 %v214_v3, %v213_v2  ;;  %680 = vmatprep.mubr.msk.f32.mxu0 %vm221_vm0, %v213_v2  ;;  %v215_v7 = vld [vmem:[%s209_s28] sm:$0xff]  ;;  %v216_v8 = vld [vmem:[%s209_s28 + $0x8] sm:$0xff]  ;;  %s542_s30 = sld [smem:[#allocation2]]  ;;  %s654_s9 = sld [smem:[#allocation2 + $0x1]] }
  0x14   : > { %705 = vmatprep.subr.msk.bf16.mxu1 %vm817_vm1, %v703_v5  ;;  %v709_v9 = vpack.c.bf16 %v216_v8, %v215_v7  ;;  %v217_v10 = vsub.f32 %v213_v2, %v215_v7  ;;  %v218_v11 = vsub.f32 %v214_v3, %v216_v8  ;;  %v234_v16 = vsub.f32 %v211_v0, %v215_v7  ;;  %s567_s17 = sshll.u32 %s869_s3, 4  ;;  %s568_s17 = int_to_ptr.vmem [resolvable:$true] %s567_s17 }
  0x15   : > { %699 = vmatprep.subr.msk.bf16.mxu0 %vm817_vm1, %v697_v6  ;;  %708 = vmatpush3.bf16.xpose.msk.msra.mxu1 %vm817_vm1, %v703_v5  ;;  %v235_v17 = vsub.f32 %v212_v1, %v216_v8  ;;  %s747_s20 = scalar_lea.vmem %s568_s17, 16  ;;  %p754_p11 = scmp.lt.s32.totalorder %s568_s17, %s568_s17 }
  0x16   : > { %702 = vmatpush3.bf16.xpose.msk.msra.mxu0 %vm817_vm1, %v697_v6  ;;  %v219_v12 = vand.u32 2147483647, %v217_v10  ;;  %v220_v13 = vand.u32 2147483647, %v218_v11  ;;  %v236_v19 = vand.u32 2147483647, %v234_v16  ;;  %p748_p8 = scmp.ne.s32.totalorder %s568_s17, %s747_s20  ;;  %p755_p12 = scmp.lt.s32.totalorder %s747_s20, %s747_s20 }
  0x17   : > { %711 = vmatprep.subr.msk.bf16.mxu0 %vm817_vm1, %v709_v9  ;;  %v237_v20 = vand.u32 2147483647, %v235_v17 }
  0x18   : > { %v222_v14 = vsel %vm221_vm0, %v219_v12, 0.0  ;;  %v223_v15 = vsel %vm221_vm0, %v220_v13, 0.0  ;;  %v238_v21 = vsel %vm221_vm0, %v236_v19, 0.0  ;;  %p749_p9 = pnand %p748_p8, %p734_p7  ;;  %p756_p13 = por %p755_p12, %p754_p11 }
  0x19   : > { %v224_v18 = vadd.f32 %v223_v15, %v222_v14  ;;  %v239_v22 = vsel %vm221_vm0, %v237_v20, 0.0 }
  0x1a   : > { %v240_v23 = vadd.f32 %v239_v22, %v238_v21  ;;  %p750_p10 = pneg %p749_p9 }
  0x1b   : > { %225 = vadd.xlane.f32.xlu0 %v224_v18 }
  0x1c   : > { %688 = vmatmul.mubr.msk.f32.vlgmr.msra.gmra.mrb[0].mxu1 %vm221_vm0, %v212_v1  ;;  %p757_p0 = pnand %p756_p13, %p750_p10 }
  0x1d   : > { %681 = vmatmul.mubr.msk.f32.vlgmr.msra.gmra.mrb[0].mxu0 %vm221_vm0, %v214_v3 }
  0x1e   : > { %714 = vmatpush3.bf16.xpose.msk.msra.mxu0 %vm817_vm1, %v709_v9  ;;  %694 = vmatprep.mubr.msk.f32.mxu0 %vm221_vm0, %v215_v7 }
  0x1f   : > { %241 = vadd.xlane.f32.xlu0 %v240_v23 }
  0x25   : > { %695 = vmatmul.mubr.msk.f32.vlgmr.msra.gmra.mrb[2].mxu0 %vm221_vm0, %v216_v8 }
  0xa8   : > { %v226_v50 = vpop.xlane.xlu0 %225 }
  0xa9   : > { %v227_v51 = vrot.slane %v226_v50, 4 }
  0xab   : > { %v228_v52 = vadd.f32 %v227_v51, %v226_v50 }
  0xac   : > { %v242_v53 = vpop.xlane.xlu0 %241 }
  0xad   : > { %v243_v54 = vrot.slane %v242_v53, 4  ;;  %v229_v55 = vrot.slane %v228_v52, 2 }
  0xaf   : > { %v244_v56 = vadd.f32 %v243_v54, %v242_v53  ;;  %v230_v59 = vadd.f32 %v229_v55, %v228_v52 }
  0xb1   : > { %v245_v57 = vrot.slane %v244_v56, 2  ;;  %v231_v60 = vrot.slane %v230_v59, 1 }
  0xb3   : > { %v246_v58 = vadd.f32 %v245_v57, %v244_v56  ;;  %v232_v62 = vadd.f32 %v231_v60, %v230_v59 }
  0xb5   : > { %v247_v61 = vrot.slane %v246_v58, 1  ;;  %715 = vpush %v232_v62 }
  0xb7   : > { %v248_v63 = vadd.f32 %v247_v61, %v246_v58 }
  0xb9   : > { %717 = vpush %v248_v63 }
  0xe6   : > { %s716_s4 = spop %715 }
  0xea   : > { %s718_s5 = spop %717 }
  0xeb   : > { %s250_s6 = sadd.f32 %s718_s5, %s716_s4 }
  0xed   : > { %s543_s7 = sadd.f32 %s542_s30, %s250_s6 }
  0xef   : > { %v689_v24 = vpop.f32.mrb[0].mxu1  ;;  %545 = sst [smem:[#allocation2]] %s543_s7  ;;  %s555_s8 = smul.f32 0.00048828125, %s543_s7 }
  0xf0   : > { %v682_v25 = vpop.f32.mrb[0].mxu0  ;;  %v406_v26 = vpop.f32.mrb[1].mxu1  ;;  %v416_v28 = vmul.f32 0.0009765625, %v689_v24 }
  0xf1   : > { %v323_v27 = vpop.f32.mrb[1].mxu0  ;;  %v415_v30 = vmul.f32 0.0009765625, %v406_v26  ;;  %v333_v31 = vmul.f32 0.0009765625, %v682_v25  ;;  %727 = sst [smem:[#allocation2]] (%p734_p7), %s555_s8 }
  0xf2   : > { %v332_v34 = vmul.f32 0.0009765625, %v323_v27 }
  0xf8   : > { %v696_v29 = vpop.f32.mrb[2].mxu0 }
  0xf9   : > { %v499_v32 = vmul.f32 0.0009765625, %v696_v29  ;;  %v489_v33 = vpop.f32.mrb[3].mxu0 }
  0xfa   : > { %v498_v35 = vmul.f32 0.0009765625, %v489_v33 }
  0xfb   : > { %v501_v36 = vsub.f32 %v333_v31, %v499_v32  ;;  %v518_v37 = vsub.f32 %v416_v28, %v499_v32 }
  0xfc   : > { %v500_v38 = vsub.f32 %v332_v34, %v498_v35  ;;  %v517_v39 = vsub.f32 %v415_v30, %v498_v35 }
  0xfd   : > { %v520_v40 = vand.u32 2147483647, %v518_v37  ;;  %v503_v41 = vand.u32 2147483647, %v501_v36 }
  0xfe   : > { %v502_v42 = vand.u32 2147483647, %v500_v38  ;;  %v519_v43 = vand.u32 2147483647, %v517_v39 }
  0xff   : > { %v506_v44 = vsel %vm504_vm2, %v503_v41, 0.0  ;;  %v522_v45 = vsel %vm504_vm2, %v520_v40, 0.0 }
 0x100   : > { %v505_v46 = vsel %vm504_vm2, %v502_v42, 0.0  ;;  %v521_v47 = vsel %vm504_vm2, %v519_v43, 0.0 }
 0x101   : > { %v507_v48 = vadd.f32 %v506_v44, %v505_v46  ;;  %v523_v49 = vadd.f32 %v522_v45, %v521_v47 }
 0x103   : > { %508 = vadd.xlane.f32.xlu1 %v507_v48 }
 0x107   : > { %524 = vadd.xlane.f32.xlu1 %v523_v49 }
 0x190   : > { %v509_v0 = vpop.xlane.xlu1 %508 }
 0x191   : > { %v510_v1 = vrot.slane %v509_v0, 4 }
 0x193   : > { %v511_v2 = vadd.f32 %v510_v1, %v509_v0 }
 0x194   : > { %v525_v3 = vpop.xlane.xlu1 %524 }
 0x195   : > { %v512_v4 = vrot.slane %v511_v2, 2  ;;  %v526_v5 = vrot.slane %v525_v3, 4 }
 0x197   : > { %v527_v6 = vadd.f32 %v526_v5, %v525_v3  ;;  %v513_v7 = vadd.f32 %v512_v4, %v511_v2 }
 0x199   : > { %v528_v8 = vrot.slane %v527_v6, 2  ;;  %v514_v9 = vrot.slane %v513_v7, 1 }
 0x19b   : > { %v529_v10 = vadd.f32 %v528_v8, %v527_v6  ;;  %v515_v11 = vadd.f32 %v514_v9, %v513_v7 }
 0x19d   : > { %719 = vpush %v515_v11  ;;  %v530_v12 = vrot.slane %v529_v10, 1 }
 0x19f   : > { %v531_v13 = vadd.f32 %v530_v12, %v529_v10 }
 0x1a1   : > { %721 = vpush %v531_v13 }
 0x1ce   : > { %s720_s10 = spop %719 }
 0x1d2   : > { %s722_s11 = spop %721 }
 0x1d3   : > { %s533_s14 = sadd.f32 %s722_s11, %s720_s10 }
 0x1d5   : > { %s547_s18 = sadd.f32 %s654_s9, %s533_s14 }
 0x1d7   : > { %549 = sst [smem:[#allocation2 + $0x1]] %s547_s18  ;;  %s558_s19 = smul.f32 0.001953125, %s547_s18 }
 0x1d9   : > { %728 = sst [smem:[#allocation2 + $0x1]] (%p734_p7), %s558_s19 }
 0x1da   : > { %760 = shalt.err (!%p757_p0)
}
 0x1db   : > { %s774_s21 = smov [#allocation2]  }
 0x1dc   : > { %730 = dma.smem_to_vmem (%p734_p7), %s774_s21, 16, %s568_s17, [#allocation3]  }
 0x1dd   : > { %766 = dma.done.wait (%p734_p7), [#allocation3], 16  }
 0x1de   : > { %768 = vsyncadd (%p734_p7), [#allocation3], 4294967280 }
 0x1df   : > { %575 = sfence }
 0x1e0 PF: > { %s14_s12 = sadd.s32 1, %s771_s12  }
 0x1e1   : > { %p11_p1 = scmp.ge.s32.totalorder %s14_s12, 4  }
 0x1e3   :  { %13 = sbr.rel (!%p11_p1) target bundleno = 1 (0x1), region = 77 }
 0x1ea   :  { %581 = vsyncpa [#allocation3], 1 }
 0x1eb   :  { %583 = vsyncpa [#allocation3 + $0x1], 1 }

// kernel: inpainting_loss.12
= control target key start
LH: loop header
LB: loop body
LE: loop exit
PB: predicated region body
PF: predicated region fallthrough
CT: control target
= control target key end

     0   :  { %s441_s12 = smov 0   ;;  %s494_s0 = inlined_call_operand.vmem [shape: f32[6,16,16], index: 0, kind: input, shape index: {}]   ;;  %s495_s1 = inlined_call_operand.vmem [shape: f32[32,16], index: 1, kind: input, shape index: {}]   ;;  %s496_s2 = inlined_call_operand.vmem [shape: f32[32,1], index: 2, kind: input, shape index: {}]   ;;  %s497_s3 = inlined_call_operand.vmem [shape: f32[6,32,16], index: 3, kind: output, shape index: {}]  }
   0x1 LB: > { %s362_s13 = sadd.s32 4294967295, %s418_s12   ;;  %p366_p0 = scmp.ge.s32.totalorder %s418_s12, 1  ;;  %s418_s12 = sphi %s441_s12, %s13_s12  }
   0x2   : > { %p137_p1 = scmp.lt.s32.totalorder %s418_s12, 7 }
   0x4   : > { %p138_p2 = pnand %p366_p0, %p137_p1 }
   0x5   : > { %p161_p3 = scmp.lt.s32.totalorder (!%p138_p2), %s362_s13, 5  ;;  %v173_v0 = vld [vmem:[%s495_s1] sm:$0xff] (!%p138_p2)  ;;  %vm201_vm0 = vcmask (!%p138_p2), 130048   ;;  %v175_v1 = vld [vmem:[%s495_s1 + $0x10] sm:$0xff] (!%p138_p2)  ;;  %v420_v4 = vmov (!%p138_p2), 0   ;;  %v180_v5 = vld [vmem:[%s496_s2 + $0x18] sm:$0xff] (!%p138_p2) }
   0x6   : > { %141 = sbr.rel (%p138_p2) target bundleno = 241 (0xf1), region = 32  ;;  %389 = vmatprep.mubr.msk.f32.mxu0 (!%p138_p2), %vm201_vm0, %v173_v0  ;;  %392 = vmatprep.mubr.msk.f32.mxu1 (!%p138_p2), %vm201_vm0, %v175_v1  ;;  %v179_v2 = vld [vmem:[%s496_s2 + $0x10] sm:$0xff] (!%p138_p2)  ;;  %v177_v3 = vld [vmem:[%s496_s2] sm:$0xff] (!%p138_p2)  ;;  %v178_v6 = vld [vmem:[%s496_s2 + $0x8] sm:$0xff] (!%p138_p2) }
   0x7   : > { %411 = vset.pattern.permute.xlu1 (!%p138_p2), %v420_v4  ;;  %410 = vset.pattern.permute.xlu0 (!%p138_p2), %v420_v4  ;;  %v174_v10 = vld [vmem:[%s495_s1 + $0x8] sm:$0xff] (!%p138_p2)  ;;  %v176_v11 = vld [vmem:[%s495_s1 + $0x18] sm:$0xff] (!%p138_p2) }
   0x8   : > { %193 = vperm.xlu1 (!%p138_p2), %411, %v179_v2   ;;  %183 = vperm.xlu0 (!%p138_p2), %410, %v177_v3  }
   0xc   : > { %198 = vperm.xlu1 (!%p138_p2), %411, %v180_v5   ;;  %188 = vperm.xlu0 (!%p138_p2), %410, %v178_v6  }
   0xd   : > { %s499_s13 = smov (!%p161_p3, %s362_s13), 5 }
   0xe   : > { %s377_s22 = sshll.u32 %s499_s13, 4  ;;  %s378_s7 = sshll.u32 %s499_s13, 5 }
   0xf   : > { %s165_s29 = scalar_lea.vmem %s494_s0, %s377_s22  ;;  %s170_s10 = scalar_lea.vmem %s497_s3, %s378_s7 }
  0x10   : > { %v171_v7 = vld [vmem:[%s165_s29] sm:$0xff]  ;;  %v172_v8 = vld [vmem:[%s165_s29 + $0x8] sm:$0xff] }
  0x11   : > { %v395_v9 = vpack.c.bf16 %v172_v8, %v171_v7 }
  0x13   : > { %396 = vmatprep.subr.bf16.mxu0 %v395_v9  ;;  %399 = vmatprep.subr.bf16.mxu1 %v395_v9 }
  0x14   : > { %398 = vmatpush3.bf16.msra.mxu0 %v395_v9  ;;  %400 = vmatpush3.bf16.msra.mxu1 %v395_v9 }
  0x17   : > { %390 = vmatmul.mubr.msk.f32.vlgmr.msra.gmra.mrb[0].mxu0 %vm201_vm0, %v174_v10  ;;  %393 = vmatmul.mubr.msk.f32.vlgmr.msra.gmra.mrb[0].mxu1 %vm201_vm0, %v176_v11 }
  0x87   : > { %v194_v12 = vpop.permute.xlu1 %193  ;;  %v184_v13 = vpop.permute.xlu0 %183 }
  0x8b   : > { %v199_v14 = vpop.permute.xlu1 %198  ;;  %v189_v15 = vpop.permute.xlu0 %188 }
  0xea   : > { %v391_v16 = vpop.f32.mrb[0].mxu0  ;;  %v394_v17 = vpop.f32.mrb[0].mxu1 }
  0xeb   : > { %v286_v18 = vadd.f32 %v391_v16, %v189_v15  ;;  %v296_v19 = vadd.f32 %v394_v17, %v199_v14  ;;  %v280_v20 = vpop.f32.mrb[1].mxu0  ;;  %v290_v21 = vpop.f32.mrb[1].mxu1 }
  0xec   : > { %v281_v22 = vadd.f32 %v280_v20, %v184_v13  ;;  %v291_v23 = vadd.f32 %v290_v21, %v194_v12 }
  0xed   : > { %v300_v24 = vmax.f32 %v286_v18, 0.0  ;;  %v302_v25 = vmax.f32 %v296_v19, 0.0 }
  0xee   : > { %v299_v26 = vmax.f32 %v281_v22, 0.0  ;;  %v301_v27 = vmax.f32 %v291_v23, 0.0 }
  0xef   : > { %304 = vst.msk [vmem:[%s170_s10 + $0x8] sm:$0xff] %vm201_vm0, %v300_v24  ;;  %306 = vst.msk [vmem:[%s170_s10 + $0x18] sm:$0xff] %vm201_vm0, %v302_v25 }
  0xf0   : > { %303 = vst.msk [vmem:[%s170_s10] sm:$0xff] %vm201_vm0, %v299_v26  ;;  %305 = vst.msk [vmem:[%s170_s10 + $0x10] sm:$0xff] %vm201_vm0, %v301_v27 }
  0xf1 PF: > { %s13_s12 = sadd.s32 1, %s418_s12  }
  0xf2   : > { %p10_p4 = scmp.ge.s32.totalorder %s13_s12, 8  }
  0xf4   :  { %12 = sbr.rel (!%p10_p4) target bundleno = 1 (0x1), region = 62 }

// kernel: inpainting_loss.15
= control target key start
LH: loop header
LB: loop body
LE: loop exit
PB: predicated region body
PF: predicated region fallthrough
CT: control target
= control target key end

     0   :  { %8 = vsyncpa [#allocation3], 0  ;;  %s954_s12 = smov 0   ;;  %s1079_s0 = inlined_call_operand.vmem [shape: f32[6,32,16], index: 0, kind: input, shape index: {}, may-alias: {0,1,2}]   ;;  %s1080_s1 = inlined_call_operand.vmem [shape: f32[6,32,16], index: 1, kind: input, shape index: {}, may-alias: {0,1,2}]   ;;  %s1081_s2 = inlined_call_operand.vmem [shape: f32[6,32,16], index: 2, kind: input, shape index: {}, may-alias: {0,1,2}]   ;;  %s1082_s3 = inlined_call_operand.vmem [shape: f32[1,2], index: 3, kind: output, shape index: {}]  }
   0x1 LB: > { %s960_s13 = sadd.s32 4294967295, %s930_s12   ;;  %p726_p0 = scmp.ge.s32.totalorder %s930_s12, 1  ;;  %s930_s12 = sphi %s954_s12, %s14_s12  }
   0x2   : > { %p161_p1 = scmp.lt.s32.totalorder %s930_s12, 3 }
   0x4   : > { %p162_p2 = pnand %p726_p0, %p161_p1 }
   0x5   : > { %p192_p3 = scmp.lt.s32.totalorder (!%p162_p2), %s960_s13, 5  ;;  %s204_s14 = sadd.s32 (!%p162_p2), 4, %s960_s13  ;;  %vm231_vm0 = vcmask (!%p162_p2), 130048   ;;  %vm584_vm2 = vcmask (!%p162_p2), 261120  }
   0x6   : > { %165 = sbr.rel (%p162_p2) target bundleno = 501 (0x1f5), region = 32  ;;  %p205_p4 = scmp.lt.s32.totalorder (!%p162_p2), %s204_s14, 5  ;;  %vm973_vm1 = vmpackc.low (!%p162_p2), %vm231_vm0, %vm231_vm0 }
   0x7   : > { %s197_s15 = sadd.s32 (!%p162_p2), 2, %s960_s13  ;;  %p892_p6 = scmp.eq.s32.totalorder (!%p162_p2), %s960_s13, 0 }
   0x8   : > { %p198_p5 = scmp.lt.s32.totalorder (!%p162_p2), %s197_s15, 5  ;;  %s932_s29 = smov (!%p162_p2), 0.0  }
   0x9   : > { %p893_p7 = scmp.eq.s32.totalorder (!%p162_p2), %s960_s13, 1 }
   0xd   : > { %s193_s16 = scalar_select %p192_p3, %s960_s13, 5 }
   0xe   : > { %s1086_s14 = smov (!%p205_p4, %s204_s14), 5  ;;  %s1088_s15 = smov (!%p198_p5, %s197_s15), 5 }
   0xf   : > { %s765_s17 = sshll.u32 %s193_s16, 5  ;;  %s767_s21 = sshll.u32 %s1086_s14, 5 }
  0x10   : > { %s196_s20 = scalar_lea.vmem %s1079_s0, %s765_s17  ;;  %s980_s24 = scalar_lea.vmem %s1081_s2, %s767_s21 }
  0x11   : > { %v211_v1 = vld [vmem:[%s196_s20] sm:$0xff]  ;;  %v212_v2 = vld [vmem:[%s196_s20 + $0x8] sm:$0xff]  ;;  %v982_v3 = vld [vmem:[%s196_s20 + $0x10] sm:$0xff]  ;;  %s766_s25 = sshll.u32 %s1088_s15, 5  ;;  %883 = sst [smem:[#allocation2]] (%p892_p6), %s932_s29 }
  0x12   : > { %v219_v4 = vld [vmem:[%s980_s24] sm:$0xff]  ;;  %v220_v5 = vld [vmem:[%s980_s24 + $0x8] sm:$0xff]  ;;  %v846_v6 = vpack.c.bf16 %v212_v2, %v211_v1  ;;  %v986_v7 = vld [vmem:[%s196_s20 + $0x18] sm:$0xff]  ;;  %814 = vmatprep.mubr.msk.f32.mxu1 %vm231_vm0, %v211_v1  ;;  %s202_s28 = scalar_lea.vmem %s1080_s1, %s766_s25  ;;  %884 = sst [smem:[#allocation2 + $0x1]] (%p892_p6), %s932_s29 }
  0x13   : > { %v248_v8 = vsub.f32 %v211_v1, %v219_v4  ;;  %v249_v9 = vsub.f32 %v212_v2, %v220_v5  ;;  %v852_v10 = vpack.c.bf16 %v986_v7, %v982_v3  ;;  %v215_v11 = vld [vmem:[%s202_s28] sm:$0xff]  ;;  %v216_v12 = vld [vmem:[%s202_s28 + $0x8] sm:$0xff]  ;;  %v217_v13 = vld [vmem:[%s202_s28 + $0x10] sm:$0xff]  ;;  %v858_v19 = vpack.c.bf16 %v220_v5, %v219_v4  ;;  %s634_s30 = sld [smem:[#allocation2]]  ;;  %s758_s9 = sld [smem:[#allocation2 + $0x1]] }
  0x14   : > { %848 = vmatprep.subr.msk.bf16.mxu1 %vm973_vm1, %v846_v6  ;;  %v223_v14 = vsub.f32 %v215_v11, %v219_v4  ;;  %v224_v15 = vsub.f32 %v216_v12, %v220_v5  ;;  %v834_v16 = vpack.c.bf16 %v216_v12, %v215_v11  ;;  %v218_v17 = vld [vmem:[%s202_s28 + $0x18] sm:$0xff]  ;;  %800 = vmatprep.mubr.msk.f32.mxu0 %vm231_vm0, %v215_v11  ;;  %v221_v20 = vld [vmem:[%s980_s24 + $0x10] sm:$0xff]  ;;  %s659_s17 = sshll.u32 %s1082_s3, 4  ;;  %s660_s17 = int_to_ptr.vmem [resolvable:$true] %s659_s17 }
  0x15   : > { %851 = vmatpush3.bf16.xpose.msk.msra.mxu1 %vm973_vm1, %v846_v6  ;;  %v840_v18 = vpack.c.bf16 %v218_v17, %v217_v13  ;;  %v222_v21 = vld [vmem:[%s980_s24 + $0x18] sm:$0xff]  ;;  %v225_v25 = vsub.f32 %v217_v13, %v221_v20  ;;  %v252_v26 = vand.u32 2147483647, %v248_v8  ;;  %v253_v31 = vand.u32 2147483647, %v249_v9  ;;  %s906_s20 = scalar_lea.vmem %s660_s17, 16  ;;  %p913_p11 = scmp.lt.s32.totalorder %s660_s17, %s660_s17 }
  0x16   : > { %854 = vmatprep.subr.msk.bf16.mxu1 %vm973_vm1, %v852_v10  ;;  %836 = vmatprep.subr.msk.bf16.mxu0 %vm973_vm1, %v834_v16  ;;  %v864_v22 = vpack.c.bf16 %v222_v21, %v221_v20  ;;  %v227_v23 = vand.u32 2147483647, %v223_v14  ;;  %v228_v24 = vand.u32 2147483647, %v224_v15  ;;  %v226_v27 = vsub.f32 %v218_v17, %v222_v21  ;;  %p907_p8 = scmp.ne.s32.totalorder %s660_s17, %s906_s20  ;;  %p914_p12 = scmp.lt.s32.totalorder %s906_s20, %s906_s20 }
  0x17   : > { %839 = vmatpush3.bf16.xpose.msk.msra.mxu0 %vm973_vm1, %v834_v16  ;;  %v229_v28 = vand.u32 2147483647, %v225_v25  ;;  %v250_v35 = vsub.f32 %v982_v3, %v221_v20  ;;  %v251_v38 = vsub.f32 %v986_v7, %v222_v21  ;;  %v256_v40 = vsel %vm231_vm0, %v252_v26, 0.0 }
  0x18   : > { %842 = vmatprep.subr.msk.bf16.mxu0 %vm973_vm1, %v840_v18  ;;  %v232_v29 = vsel %vm231_vm0, %v227_v23, 0.0  ;;  %v233_v30 = vsel %vm231_vm0, %v228_v24, 0.0  ;;  %v230_v33 = vand.u32 2147483647, %v226_v27  ;;  %v257_v42 = vsel %vm231_vm0, %v253_v31, 0.0  ;;  %p908_p9 = pnand %p907_p8, %p893_p7  ;;  %p915_p13 = por %p914_p12, %p913_p11 }
  0x19   : > { %v234_v32 = vadd.f32 %v233_v30, %v232_v29  ;;  %v235_v34 = vsel %vm231_vm0, %v229_v28, 0.0  ;;  %v254_v39 = vand.u32 2147483647, %v250_v35  ;;  %v255_v43 = vand.u32 2147483647, %v251_v38 }
  0x1a   : > { %v237_v37 = vsel %vm231_vm0, %v230_v33, 0.0  ;;  %v258_v44 = vadd.f32 %v257_v42, %v256_v40  ;;  %p909_p10 = pneg %p908_p9 }
  0x1b   : > { %v236_v36 = vadd.f32 %v235_v34, %v234_v32  ;;  %v259_v45 = vsel %vm231_vm0, %v254_v39, 0.0  ;;  %v261_v47 = vsel %vm231_vm0, %v255_v43, 0.0 }
  0x1c   : > { %v260_v46 = vadd.f32 %v259_v45, %v258_v44  ;;  %p916_p0 = pnand %p915_p13, %p909_p10 }
  0x1d   : > { %857 = vmatpush3.bf16.xpose.msk.msra.mxu1 %vm973_vm1, %v852_v10  ;;  %v238_v41 = vadd.f32 %v237_v37, %v236_v36 }
  0x1e   : > { %870 = vmatprep.subr.msk.bf16.mxu1 %vm973_vm1, %v858_v19  ;;  %v262_v48 = vadd.f32 %v261_v47, %v260_v46 }
  0x1f   : > { %845 = vmatpush3.bf16.xpose.msk.msra.mxu0 %vm973_vm1, %v840_v18  ;;  %239 = vadd.xlane.f32.xlu0 %v238_v41 }
  0x20   : > { %860 = vmatprep.subr.msk.bf16.mxu0 %vm973_vm1, %v858_v19 }
  0x23   : > { %263 = vadd.xlane.f32.xlu0 %v262_v48 }
  0x24   : > { %815 = vmatmul.mubr.msk.f32.vlgmr.msra.gmra.mrb[0].mxu1 %vm231_vm0, %v212_v2 }
  0x25   : > { %872 = vmatpush3.bf16.xpose.msk.msra.mxu1 %vm973_vm1, %v858_v19  ;;  %817 = vmatprep.mubr.msk.f32.mxu1 %vm231_vm0, %v982_v3 }
  0x26   : > { %871 = vmatprep.subr.msk.bf16.mxu1 %vm973_vm1, %v864_v22  ;;  %801 = vmatmul.mubr.msk.f32.vlgmr.msra.gmra.mrb[0].mxu0 %vm231_vm0, %v216_v12 }
  0x27   : > { %863 = vmatpush3.bf16.xpose.msk.msra.mxu0 %vm973_vm1, %v858_v19  ;;  %803 = vmatprep.mubr.msk.f32.mxu0 %vm231_vm0, %v217_v13 }
  0x28   : > { %818 = vmatmul.mubr.msk.f32.gmra.mrb[2].mxu1 %vm231_vm0, %v986_v7  ;;  %866 = vmatprep.subr.msk.bf16.mxu0 %vm973_vm1, %v864_v22 }
  0x29   : > { %831 = vmatprep.mubr.msk.f32.mxu1 %vm231_vm0, %v221_v20 }
  0x2a   : > { %804 = vmatmul.mubr.msk.f32.gmra.mrb[2].mxu0 %vm231_vm0, %v218_v17 }
  0x2b   : > { %828 = vmatprep.mubr.msk.f32.mxu0 %vm231_vm0, %v219_v4 }
  0x2d   : > { %873 = vmatpush3.bf16.xpose.msk.msra.mxu1 %vm973_vm1, %v864_v22 }
  0x2f   : > { %869 = vmatpush3.bf16.xpose.msk.msra.mxu0 %vm973_vm1, %v864_v22 }
  0x34   : > { %832 = vmatmul.mubr.msk.f32.vlgmr.msra.gmra.mrb[4].mxu1 %vm231_vm0, %v222_v21 }
  0x36   : > { %829 = vmatmul.mubr.msk.f32.vlgmr.msra.gmra.mrb[4].mxu0 %vm231_vm0, %v220_v5 }
  0xac   : > { %v240_v39 = vpop.xlane.xlu0 %239 }
  0xad   : > { %v241_v40 = vrot.slane %v240_v39, 4 }
  0xaf   : > { %v242_v41 = vadd.f32 %v241_v40, %v240_v39 }
  0xb0   : > { %v264_v42 = vpop.xlane.xlu0 %263 }
  0xb1   : > { %v265_v43 = vrot.slane %v264_v42, 4  ;;  %v243_v44 = vrot.slane %v242_v41, 2 }
  0xb3   : > { %v266_v45 = vadd.f32 %v265_v43, %v264_v42  ;;  %v244_v47 = vadd.f32 %v243_v44, %v242_v41 }
  0xb5   : > { %v267_v46 = vrot.slane %v266_v45, 2 }
  0xb7   : > { %v268_v48 = vadd.f32 %v267_v46, %v266_v45 }
  0xf7   : > { %v816_v49 = vpop.f32.mrb[0].mxu1 }
  0xf8   : > { %v452_v50 = vpop.f32.mrb[1].mxu1  ;;  %v472_v7 = vmul.f32 0.001953125, %v816_v49  ;;  %v245_v49 = vrot.slane %v244_v47, 1 }
  0xf9   : > { %v802_v52 = vpop.f32.mrb[0].mxu0  ;;  %v471_v11 = vmul.f32 0.001953125, %v452_v50  ;;  %v269_v50 = vrot.slane %v268_v48, 1 }
  0xfa   : > { %v351_v54 = vpop.f32.mrb[1].mxu0  ;;  %v371_v6 = vmul.f32 0.001953125, %v802_v52 }
  0xfb   : > { %v819_v51 = vpop.f32.mrb[2].mxu1  ;;  %v370_v10 = vmul.f32 0.001953125, %v351_v54  ;;  %v270_v52 = vadd.f32 %v269_v50, %v268_v48 }
  0xfc   : > { %v462_v53 = vpop.f32.mrb[3].mxu1  ;;  %v474_v57 = vmul.f32 0.001953125, %v819_v51  ;;  %v246_v51 = vadd.f32 %v245_v49, %v244_v47 }
  0xfd   : > { %v805_v55 = vpop.f32.mrb[2].mxu0  ;;  %v473_v63 = vmul.f32 0.001953125, %v462_v53 }
  0xfe   : > { %v361_v56 = vpop.f32.mrb[3].mxu0  ;;  %v373_v59 = vmul.f32 0.001953125, %v805_v55  ;;  %874 = vpush %v246_v51 }
  0xff   : > { %v372_v62 = vmul.f32 0.001953125, %v361_v56  ;;  %876 = vpush %v270_v52 }
 0x107   : > { %v833_v58 = vpop.f32.mrb[4].mxu1 }
 0x108   : > { %v575_v60 = vmul.f32 0.001953125, %v833_v58  ;;  %v563_v61 = vpop.f32.mrb[5].mxu1 }
 0x109   : > { %v574_v0 = vmul.f32 0.001953125, %v563_v61  ;;  %v830_v5 = vpop.f32.mrb[4].mxu0 }
 0x10a   : > { %v579_v1 = vsub.f32 %v373_v59, %v575_v60  ;;  %v604_v2 = vsub.f32 %v474_v57, %v575_v60  ;;  %v573_v8 = vmul.f32 0.001953125, %v830_v5  ;;  %v553_v9 = vpop.f32.mrb[5].mxu0 }
 0x10b   : > { %v578_v3 = vsub.f32 %v372_v62, %v574_v0  ;;  %v603_v4 = vsub.f32 %v473_v63, %v574_v0  ;;  %v572_v12 = vmul.f32 0.001953125, %v553_v9 }
 0x10c   : > { %v577_v13 = vsub.f32 %v371_v6, %v573_v8  ;;  %v602_v14 = vsub.f32 %v472_v7, %v573_v8  ;;  %v608_v25 = vand.u32 2147483647, %v604_v2  ;;  %v583_v28 = vand.u32 2147483647, %v579_v1 }
 0x10d   : > { %v576_v15 = vsub.f32 %v370_v10, %v572_v12  ;;  %v601_v16 = vsub.f32 %v471_v11, %v572_v12  ;;  %v582_v19 = vand.u32 2147483647, %v578_v3  ;;  %v607_v20 = vand.u32 2147483647, %v603_v4 }
 0x10e   : > { %v581_v17 = vand.u32 2147483647, %v577_v13  ;;  %v606_v18 = vand.u32 2147483647, %v602_v14  ;;  %v590_v35 = vsel %vm584_vm2, %v583_v28, 0.0  ;;  %v614_v36 = vsel %vm584_vm2, %v608_v25, 0.0 }
 0x10f   : > { %v580_v21 = vand.u32 2147483647, %v576_v15  ;;  %v605_v22 = vand.u32 2147483647, %v601_v16  ;;  %v612_v31 = vsel %vm584_vm2, %v607_v20, 0.0  ;;  %v588_v32 = vsel %vm584_vm2, %v582_v19, 0.0 }
 0x110   : > { %v610_v23 = vsel %vm584_vm2, %v606_v18, 0.0  ;;  %v586_v24 = vsel %vm584_vm2, %v581_v17, 0.0 }
 0x111   : > { %v585_v26 = vsel %vm584_vm2, %v580_v21, 0.0  ;;  %v609_v27 = vsel %vm584_vm2, %v605_v22, 0.0 }
 0x112   : > { %v611_v29 = vadd.f32 %v610_v23, %v609_v27  ;;  %v587_v30 = vadd.f32 %v586_v24, %v585_v26 }
 0x114   : > { %v589_v33 = vadd.f32 %v588_v32, %v587_v30  ;;  %v613_v34 = vadd.f32 %v612_v31, %v611_v29 }
 0x116   : > { %v591_v37 = vadd.f32 %v590_v35, %v589_v33  ;;  %v615_v38 = vadd.f32 %v614_v36, %v613_v34 }
 0x118   : > { %592 = vadd.xlane.f32.xlu1 %v591_v37 }
 0x11c   : > { %616 = vadd.xlane.f32.xlu1 %v615_v38 }
 0x12f   : > { %s875_s4 = spop %874 }
 0x130   : > { %s877_s5 = spop %876 }
 0x131   : > { %s272_s6 = sadd.f32 %s877_s5, %s875_s4 }
 0x133   : > { %s635_s7 = sadd.f32 %s634_s30, %s272_s6 }
 0x135   : > { %637 = sst [smem:[#allocation2]] %s635_s7  ;;  %s647_s8 = smul.f32 0.0009765625, %s635_s7 }
 0x137   : > { %886 = sst [smem:[#allocation2]] (%p893_p7), %s647_s8 }
 0x1a5   : > { %v593_v53 = vpop.xlane.xlu1 %592 }
 0x1a6   : > { %v594_v54 = vrot.slane %v593_v53, 4 }
 0x1a8   : > { %v595_v55 = vadd.f32 %v594_v54, %v593_v53 }
 0x1a9   : > { %v617_v56 = vpop.xlane.xlu1 %616 }
 0x1aa   : > { %v596_v57 = vrot.slane %v595_v55, 2  ;;  %v618_v58 = vrot.slane %v617_v56, 4 }
 0x1ac   : > { %v619_v59 = vadd.f32 %v618_v58, %v617_v56  ;;  %v597_v60 = vadd.f32 %v596_v57, %v595_v55 }
 0x1ae   : > { %v620_v61 = vrot.slane %v619_v59, 2  ;;  %v598_v62 = vrot.slane %v597_v60, 1 }
 0x1b0   : > { %v621_v63 = vadd.f32 %v620_v61, %v619_v59  ;;  %v599_v0 = vadd.f32 %v598_v62, %v597_v60 }
 0x1b2   : > { %878 = vpush %v599_v0  ;;  %v622_v1 = vrot.slane %v621_v63, 1 }
 0x1b4   : > { %v623_v2 = vadd.f32 %v622_v1, %v621_v63 }
 0x1b6   : > { %880 = vpush %v623_v2 }
 0x1e3   : > { %s879_s10 = spop %878 }
 0x1e7   : > { %s881_s11 = spop %880 }
 0x1e8   : > { %s625_s14 = sadd.f32 %s881_s11, %s879_s10 }
 0x1ea   : > { %s639_s18 = sadd.f32 %s758_s9, %s625_s14 }
 0x1ec   : > { %641 = sst [smem:[#allocation2 + $0x1]] %s639_s18  ;;  %s650_s19 = smul.f32 0.00048828125, %s639_s18 }
 0x1ee   : > { %887 = sst [smem:[#allocation2 + $0x1]] (%p893_p7), %s650_s19 }
 0x1ef   : > { %919 = shalt.err (!%p916_p0)
}
 0x1f0   : > { %s933_s21 = smov [#allocation2]  }
 0x1f1   : > { %889 = dma.smem_to_vmem (%p893_p7), %s933_s21, 16, %s660_s17, [#allocation3]  }
 0x1f2   : > { %925 = dma.done.wait (%p893_p7), [#allocation3], 16  }
 0x1f3   : > { %927 = vsyncadd (%p893_p7), [#allocation3], 4294967280 }
 0x1f4   : > { %667 = sfence }
 0x1f5 PF: > { %s14_s12 = sadd.s32 1, %s930_s12  }
 0x1f6   : > { %p11_p1 = scmp.ge.s32.totalorder %s14_s12, 4  }
 0x1f8   :  { %13 = sbr.rel (!%p11_p1) target bundleno = 1 (0x1), region = 77 }
 0x1ff   :  { %673 = vsyncpa [#allocation3], 1 }
 0x200   :  { %675 = vsyncpa [#allocation3 + $0x1], 1 }

</bundles_post_ra>
